<compile_context>
chip_gen: v7x
topology: tpu7x:2x2x1
jax: 0.10.0
libtpu: 0.0.40
codegen_flags: <defaults>
</compile_context>

<pallas_src>
import math

import jax
import jax.numpy as jnp
import numpy as np
from jax.experimental import pallas as pl
from jax.experimental.pallas import tpu as pltpu


def _round_up(x: int, m: int) -> int:
    return (x + m - 1) // m * m


def _pad_expert_dim(d: int, num_experts: int, last: bool) -> int:
    """Per-expert padded width so the stacked width E*p is a multiple of 128.
    The last layer is padded to a 128 multiple per expert so the gate combine
    uses 128-aligned lane slices and the HBM store is lane-dense."""
    if last:
        return _round_up(d, 128)
    q = 128 // math.gcd(num_experts, 128)
    return _round_up(d, q)


def _make_moe_kernel(num_layers, export_num, p_last, gate_offset, mxu_dtype):
    """Kernel closed over static layer/expert counts, padded last-layer width,
    the lane offset of the fused gate logits, and the MXU feed dtype."""

    def kernel(*refs):
        x_ref = refs[0]                                   # [TB, D_in]
        layer_refs = refs[1:1 + 2 * num_layers]           # fused (W_l, b_l) * L
        out_ref = refs[1 + 2 * num_layers]                # [TB, p_last]

        xb = x_ref[...].astype(mxu_dtype)                 # MXU feed dtype

        # --- layer 0: experts' first Linear + gate projection in ONE matmul ---
        w0 = layer_refs[0][...]                           # [D_in, E*p1 + 128k]
        b0 = layer_refs[1][...]                           # [1,    E*p1 + 128k] f32
        h0 = jnp.dot(xb, w0, preferred_element_type=jnp.float32) + b0

        # gate logits live in the trailing 128-aligned column group
        logits = h0[:, gate_offset:gate_offset + export_num]       # [TB, E] f32
        m = jnp.max(logits, axis=-1, keepdims=True)
        e = jnp.exp(logits - m)
        gate = e * pl.reciprocal(jnp.sum(e, axis=-1, keepdims=True),
                                 approx=True)                       # [TB, E] f32

        # expert activations (ReLU; Dropout == identity at inference)
        h = jnp.maximum(h0[:, :gate_offset], 0.0)                   # [TB, E*p1]

        # --- remaining expert layers: one block-diag, lane-dense matmul each ---
        for l in range(1, num_layers):
            w = layer_refs[2 * l][...]                    # [E*p_l, E*p_{l+1}]
            b = layer_refs[2 * l + 1][...]                # [1, E*p_{l+1}] f32
            h = jnp.dot(h.astype(mxu_dtype), w,
                        preferred_element_type=jnp.float32) + b
            h = jnp.maximum(h, 0.0)

        # --- combine in 2-D lane layout: E static, 128-aligned lane slices ---
        combined = h[:, 0:p_last] * gate[:, 0:1]
        for ex in range(1, export_num):
            combined = combined + (h[:, ex * p_last:(ex + 1) * p_last]
                                   * gate[:, ex:ex + 1])
        out_ref[...] = combined.astype(out_ref.dtype)

    return kernel


def prepare_moe_params(wg, bg, layer_params, mxu_dtype=jnp.bfloat16):
    """One-time, host-side fusion of per-expert weights into lane-dense
    stacked / block-diagonal matrices.  Weights are static across steps, so
    none of this is on the per-call hot path."""
    assert len(layer_params) >= 1, "MoE expert MLP needs at least one layer"
    D_in, E = int(wg.shape[0]), int(wg.shape[1])
    L = len(layer_params)
    dims = [D_in] + [int(w.shape[-1]) for w, _ in layer_params]
    pads = [_pad_expert_dim(dims[l + 1], E, last=(l == L - 1)) for l in range(L)]

    wg_np = np.asarray(wg, dtype=np.float32)
    bg_np = np.asarray(bg, dtype=np.float32)

    fused = []
    # layer 0: per-expert first Linear stacked along columns + gate columns
    p1, d1 = pads[0], dims[1]
    gate_cols = _round_up(E, 128)
    w0 = np.zeros((D_in, E * p1 + gate_cols), np.float32)
    b0 = np.zeros((1, E * p1 + gate_cols), np.float32)
    w_np = np.asarray(layer_params[0][0], dtype=np.float32)
    b_np = np.asarray(layer_params[0][1], dtype=np.float32)
    for ex in range(E):
        w0[:, ex * p1:ex * p1 + d1] = w_np[ex]
        b0[0, ex * p1:ex * p1 + d1] = b_np[ex]
    w0[:, E * p1:E * p1 + E] = wg_np
    b0[0, E * p1:E * p1 + E] = bg_np
    fused.append((jnp.asarray(w0, dtype=mxu_dtype), jnp.asarray(b0)))

    # layers 1..L-1: block-diagonal per-expert Linears
    # TODO(synk): for large E / wide experts block-diag wastes E x FLOPs & VMEM
    #   (only E of E^2 blocks are nonzero); switch to an "arbitrary" expert
    #   grid axis with a VMEM accumulator + pl.Buffered weight streaming.
    for l in range(1, L):
        pin, pout = pads[l - 1], pads[l]
        din, dout = dims[l], dims[l + 1]
        wl = np.zeros((E * pin, E * pout), np.float32)
        bl = np.zeros((1, E * pout), np.float32)
        w_np = np.asarray(layer_params[l][0], dtype=np.float32)
        b_np = np.asarray(layer_params[l][1], dtype=np.float32)
        for ex in range(E):
            wl[ex * pin:ex * pin + din, ex * pout:ex * pout + dout] = w_np[ex]
            bl[0, ex * pout:ex * pout + dout] = b_np[ex]
        fused.append((jnp.asarray(wl, dtype=mxu_dtype), jnp.asarray(bl)))

    return dict(
        fused=fused, export_num=E, num_layers=L, d_in=D_in, d_out=dims[-1],
        p_last=pads[-1], gate_offset=E * p1, mxu_dtype=mxu_dtype,
    )


def moe_forward(x, params, *, tile_b=512):
    """x: [B, D_in]; params: output of prepare_moe_params (built once)."""
    B, D_in = x.shape
    assert D_in == params["d_in"]
    E = params["export_num"]
    L = params["num_layers"]
    p_last = params["p_last"]
    fused = params["fused"]

    # Batch tile: as large as possible while keeping >= 2 grid steps so the
    # "parallel" axis occupies both v7x TensorCores; rounded for sublane
    # packing of the MXU feed dtype.
    sub = max(8, 32 // np.dtype(params["mxu_dtype"]).itemsize)
    tb = max(sub, min(tile_b, _round_up(pl.cdiv(B, 2), sub)))
    Bp = _round_up(B, tb)
    x_p = x if Bp == B else jnp.pad(x, ((0, Bp - B), (0, 0)))

    in_specs = [pl.BlockSpec((tb, D_in), lambda i: (i, 0))]   # x: batch-tiled
    operands = [x_p]
    for wf, bf in fused:                                      # weights resident
        in_specs.append(pl.BlockSpec(wf.shape, lambda i: (0, 0)))
        in_specs.append(pl.BlockSpec(bf.shape, lambda i: (0, 0)))
        operands += [wf, bf]

    # VMEM budget: resident weights (x2 buffering) + double-buffered tiles;
    # keep a tight cap so v7x (64 MiB/TC) retains compiler headroom.
    weight_bytes = sum(w.size * w.dtype.itemsize + b.size * b.dtype.itemsize
                       for w, b in fused)
    tile_bytes = (2 * tb * D_in * x.dtype.itemsize
                  + 2 * tb * p_last * x.dtype.itemsize)
    vmem_limit = 48 * 1024 * 1024
    if 2 * weight_bytes + 2 * tile_bytes > vmem_limit:
        # TODO(synk): stream expert weights over a grid axis instead of
        # holding them resident when they outgrow the VMEM budget.
        raise ValueError("fused MoE weights exceed the VMEM budget; "
                         "reduce expert width/count or stream weights")

    # Advisory cost estimate so XLA schedules/overlaps around the custom call.
    flops = 2 * Bp * D_in * fused[0][0].shape[1]
    for wf, _ in fused[1:]:
        flops += 2 * Bp * wf.shape[0] * wf.shape[1]
    flops += 2 * Bp * E * p_last                              # gate combine
    bytes_accessed = (x_p.size * x_p.dtype.itemsize + weight_bytes
                      + Bp * p_last * x.dtype.itemsize)
    cost = pl.CostEstimate(flops=int(flops), transcendentals=int(Bp * E),
                           bytes_accessed=int(bytes_accessed))

    kernel = _make_moe_kernel(L, E, p_last, params["gate_offset"],
                              params["mxu_dtype"])

    out = pl.pallas_call(
        kernel,
        out_shape=jax.ShapeDtypeStruct((Bp, p_last), x.dtype),
        grid_spec=pltpu.PrefetchScalarGridSpec(
            num_scalar_prefetch=0,
            grid=(Bp // tb,),
            in_specs=in_specs,
            out_specs=pl.BlockSpec((tb, p_last), lambda i: (i, 0)),
        ),
        compiler_params=pltpu.CompilerParams(
            dimension_semantics=("parallel",),        # batch rows independent
            vmem_limit_bytes=vmem_limit,
        ),
        cost_estimate=cost,
    )(*operands)

    return out[:B, :params["d_out"]]


def moe_reference(x, wg, bg, layer_params, mxu_dtype=None):
    """Pure-JAX reference matching the PyTorch forward.  If mxu_dtype is set,
    matmul inputs are cast (f32 accumulation) to match the kernel's MXU feed."""
    cast = (lambda a: a.astype(mxu_dtype)) if mxu_dtype is not None else (lambda a: a)
    logits = jnp.dot(cast(x), cast(wg), preferred_element_type=jnp.float32) + bg
    gate = jax.nn.softmax(logits, axis=-1)                    # [B, E]
    E = wg.shape[1]
    experts = []
    for ex in range(E):
        h = x
        for (w_l, b_l) in layer_params:
            h = jnp.maximum(
                jnp.dot(cast(h), cast(w_l[ex]),
                        preferred_element_type=jnp.float32) + b_l[ex], 0.0)
        experts.append(h)
    experts = jnp.stack(experts, axis=1)                      # [B, E, D_out]
    return jnp.einsum("be,bed->bd", gate, experts)


if __name__ == "__main__":
    # Config consistent with MoE(moe_arch=(E, export_arch), inp_dim, dropout).
    B, D_in = 256, 32
    export_num = 4
    export_arch = [32, 16]     # MLP hidden dims; output dim = 16
    dropout = 0.1              # inactive at inference (identity)

    key = jax.random.PRNGKey(0)
    k_x, k_wg, k_bg, *k_layers = jax.random.split(key, 3 + 2 * len(export_arch))

    x = jax.random.normal(k_x, (B, D_in), dtype=jnp.float32)
    wg = jax.random.normal(k_wg, (D_in, export_num), dtype=jnp.float32) * 0.1
    bg = jax.random.normal(k_bg, (export_num,), dtype=jnp.float32) * 0.1

    layer_params = []
    d_prev = D_in
    for li, d_next in enumerate(export_arch):
        w = jax.random.normal(
            k_layers[2 * li], (export_num, d_prev, d_next), dtype=jnp.float32) * 0.1
        b = jax.random.normal(
            k_layers[2 * li + 1], (export_num, d_next), dtype=jnp.float32) * 0.1
        layer_params.append((w, b))
        d_prev = d_next

    # One-time weight fusion (off the hot path); bf16 MXU feed by default.
    params = prepare_moe_params(wg, bg, layer_params, mxu_dtype=jnp.bfloat16)

    out = moe_forward(x, params, tile_b=512)
    out = jax.block_until_ready(out)
    assert out.shape == (B, export_arch[-1])

    # Tight check vs. a reference using the same bf16 MXU-feed precision.
    ref_bf16 = moe_reference(x, wg, bg, layer_params, mxu_dtype=jnp.bfloat16)
    err_bf16 = float(jnp.max(jnp.abs(out - ref_bf16)))
    assert err_bf16 < 1e-2, f"bf16-matched reference max abs err {err_bf16}"

    # Loose check vs. the full-f32 PyTorch-semantics reference.
    ref_f32 = moe_reference(x, wg, bg, layer_params)
    err_f32 = float(jnp.max(jnp.abs(out - ref_f32)))
    assert err_f32 < 6e-2, f"f32 reference max abs err {err_f32}"

    print("KERNEL_OK")
</pallas_src>

<mosaic_0001>
module attributes {stable_mosaic.version = 11 : i64} {
  func.func @kernel(%arg0: i32, %arg1: memref<128x32xf32, #tpu.memory_space<vmem>>, %arg2: memref<32x256xbf16, #tpu.memory_space<vmem>>, %arg3: memref<1x256xf32, #tpu.memory_space<vmem>>, %arg4: memref<128x512xbf16, #tpu.memory_space<vmem>>, %arg5: memref<1x512xf32, #tpu.memory_space<vmem>>, %arg6: memref<128x128xf32, #tpu.memory_space<vmem>>) attributes {dimension_semantics = [#tpu.dimension_semantics<parallel>], iteration_bounds = array<i64: 2>, scalar_prefetch = 0 : i64, scratch_operands = 0 : i64, tpu.core_type = #tpu.core_type<tc>, window_params = [{transform_indices = @transform_0, window_bounds = array<i64: 128, 32>}, {pipeline_mode = #tpu.pipeline_mode<synchronous>, transform_indices = @transform_1, window_bounds = array<i64: 32, 256>}, {pipeline_mode = #tpu.pipeline_mode<synchronous>, transform_indices = @transform_2, window_bounds = array<i64: 1, 256>}, {pipeline_mode = #tpu.pipeline_mode<synchronous>, transform_indices = @transform_3, window_bounds = array<i64: 128, 512>}, {pipeline_mode = #tpu.pipeline_mode<synchronous>, transform_indices = @transform_4, window_bounds = array<i64: 1, 512>}, {transform_indices = @transform_5, window_bounds = array<i64: 128, 128>}]} {
    %c0 = arith.constant 0 : index
    %c0_0 = arith.constant 0 : index
    %0 = vector.load %arg1[%c0, %c0_0] : memref<128x32xf32, #tpu.memory_space<vmem>>, vector<128x32xf32>
    %1 = arith.truncf %0 : vector<128x32xf32> to vector<128x32xbf16>
    %c0_1 = arith.constant 0 : index
    %c0_2 = arith.constant 0 : index
    %2 = vector.load %arg2[%c0_1, %c0_2] : memref<32x256xbf16, #tpu.memory_space<vmem>>, vector<32x256xbf16>
    %c0_3 = arith.constant 0 : index
    %c0_4 = arith.constant 0 : index
    %3 = vector.load %arg3[%c0_3, %c0_4] : memref<1x256xf32, #tpu.memory_space<vmem>>, vector<1x256xf32>
    %cst = arith.constant dense<0.000000e+00> : vector<128x256xf32>
    %4 = tpu.matmul %1, %2, %cst {dimension_numbers = #tpu.dot_dimension_numbers<[1], [0], [0], [1], [0, 0, 1, 1], [], []>} : vector<128x32xbf16>, vector<32x256xbf16>, vector<128x256xf32> -> vector<128x256xf32>
    %5 = vector.broadcast %3 : vector<1x256xf32> to vector<128x256xf32>
    %6 = arith.addf %4, %5 : vector<128x256xf32>
    %7 = vector.extract_strided_slice %6 {offsets = [0, 128], sizes = [128, 4], strides = [1, 1]} : vector<128x256xf32> to vector<128x4xf32>
    %cst_5 = arith.constant dense<0xFF800000> : vector<128xf32>
    %8 = vector.multi_reduction <maximumf>, %7, %cst_5 [1] : vector<128x4xf32> to vector<128xf32>
    %9 = vector.shape_cast %8 : vector<128xf32> to vector<128x1xf32>
    %10 = vector.broadcast %9 : vector<128x1xf32> to vector<128x4xf32>
    %11 = arith.subf %7, %10 : vector<128x4xf32>
    %12 = math.exp %11 : vector<128x4xf32>
    %cst_6 = arith.constant dense<0.000000e+00> : vector<128xf32>
    %13 = vector.multi_reduction <add>, %12, %cst_6 [1] : vector<128x4xf32> to vector<128xf32>
    %14 = vector.shape_cast %13 : vector<128xf32> to vector<128x1xf32>
    %15 = tpu.reciprocal %14 {approx = true} : vector<128x1xf32> -> vector<128x1xf32>
    %16 = vector.broadcast %15 : vector<128x1xf32> to vector<128x4xf32>
    %17 = arith.mulf %12, %16 : vector<128x4xf32>
    %18 = vector.extract_strided_slice %6 {offsets = [0, 0], sizes = [128, 128], strides = [1, 1]} : vector<128x256xf32> to vector<128x128xf32>
    %cst_7 = arith.constant 0.000000e+00 : f32
    %19 = vector.broadcast %cst_7 : f32 to vector<128x128xf32>
    %20 = arith.maximumf %18, %19 : vector<128x128xf32>
    %c0_8 = arith.constant 0 : index
    %c0_9 = arith.constant 0 : index
    %21 = vector.load %arg4[%c0_8, %c0_9] : memref<128x512xbf16, #tpu.memory_space<vmem>>, vector<128x512xbf16>
    %c0_10 = arith.constant 0 : index
    %c0_11 = arith.constant 0 : index
    %22 = vector.load %arg5[%c0_10, %c0_11] : memref<1x512xf32, #tpu.memory_space<vmem>>, vector<1x512xf32>
    %23 = arith.truncf %20 : vector<128x128xf32> to vector<128x128xbf16>
    %cst_12 = arith.constant dense<0.000000e+00> : vector<128x512xf32>
    %24 = tpu.matmul %23, %21, %cst_12 {dimension_numbers = #tpu.dot_dimension_numbers<[1], [0], [0], [1], [0, 0, 1, 1], [], []>} : vector<128x128xbf16>, vector<128x512xbf16>, vector<128x512xf32> -> vector<128x512xf32>
    %25 = vector.broadcast %22 : vector<1x512xf32> to vector<128x512xf32>
    %26 = arith.addf %24, %25 : vector<128x512xf32>
    %cst_13 = arith.constant 0.000000e+00 : f32
    %27 = vector.broadcast %cst_13 : f32 to vector<128x512xf32>
    %28 = arith.maximumf %26, %27 : vector<128x512xf32>
    %29 = vector.extract_strided_slice %28 {offsets = [0, 0], sizes = [128, 128], strides = [1, 1]} : vector<128x512xf32> to vector<128x128xf32>
    %30 = vector.extract_strided_slice %17 {offsets = [0, 0], sizes = [128, 1], strides = [1, 1]} : vector<128x4xf32> to vector<128x1xf32>
    %31 = vector.broadcast %30 : vector<128x1xf32> to vector<128x128xf32>
    %32 = arith.mulf %29, %31 : vector<128x128xf32>
    %33 = vector.extract_strided_slice %28 {offsets = [0, 128], sizes = [128, 128], strides = [1, 1]} : vector<128x512xf32> to vector<128x128xf32>
    %34 = vector.extract_strided_slice %17 {offsets = [0, 1], sizes = [128, 1], strides = [1, 1]} : vector<128x4xf32> to vector<128x1xf32>
    %35 = vector.broadcast %34 : vector<128x1xf32> to vector<128x128xf32>
    %36 = arith.mulf %33, %35 : vector<128x128xf32>
    %37 = arith.addf %32, %36 : vector<128x128xf32>
    %38 = vector.extract_strided_slice %28 {offsets = [0, 256], sizes = [128, 128], strides = [1, 1]} : vector<128x512xf32> to vector<128x128xf32>
    %39 = vector.extract_strided_slice %17 {offsets = [0, 2], sizes = [128, 1], strides = [1, 1]} : vector<128x4xf32> to vector<128x1xf32>
    %40 = vector.broadcast %39 : vector<128x1xf32> to vector<128x128xf32>
    %41 = arith.mulf %38, %40 : vector<128x128xf32>
    %42 = arith.addf %37, %41 : vector<128x128xf32>
    %43 = vector.extract_strided_slice %28 {offsets = [0, 384], sizes = [128, 128], strides = [1, 1]} : vector<128x512xf32> to vector<128x128xf32>
    %44 = vector.extract_strided_slice %17 {offsets = [0, 3], sizes = [128, 1], strides = [1, 1]} : vector<128x4xf32> to vector<128x1xf32>
    %45 = vector.broadcast %44 : vector<128x1xf32> to vector<128x128xf32>
    %46 = arith.mulf %43, %45 : vector<128x128xf32>
    %47 = arith.addf %42, %46 : vector<128x128xf32>
    %c0_14 = arith.constant 0 : index
    %c0_15 = arith.constant 0 : index
    %48 = vector.load %arg6[%c0_14, %c0_15] : memref<128x128xf32, #tpu.memory_space<vmem>>, vector<128x128xf32>
    tpu.vector_store %arg6[%c0_14, %c0_15], %47 {strides = array<i32>} : memref<128x128xf32, #tpu.memory_space<vmem>>, vector<128x128xf32>,
    return
  }
  func.func @transform_0(%arg0: i32) -> (i32, i32) {
    %c0_i32 = arith.constant 0 : i32
    %c0_i32_0 = arith.constant 0 : i32
    return %arg0, %c0_i32 : i32, i32
  }
  func.func @transform_1(%arg0: i32) -> (i32, i32) {
    %c0_i32 = arith.constant 0 : i32
    %c0_i32_0 = arith.constant 0 : i32
    %c0_i32_1 = arith.constant 0 : i32
    return %c0_i32, %c0_i32_0 : i32, i32
  }
  func.func @transform_2(%arg0: i32) -> (i32, i32) {
    %c0_i32 = arith.constant 0 : i32
    %c0_i32_0 = arith.constant 0 : i32
    %c0_i32_1 = arith.constant 0 : i32
    return %c0_i32, %c0_i32_0 : i32, i32
  }
  func.func @transform_3(%arg0: i32) -> (i32, i32) {
    %c0_i32 = arith.constant 0 : i32
    %c0_i32_0 = arith.constant 0 : i32
    %c0_i32_1 = arith.constant 0 : i32
    return %c0_i32, %c0_i32_0 : i32, i32
  }
  func.func @transform_4(%arg0: i32) -> (i32, i32) {
    %c0_i32 = arith.constant 0 : i32
    %c0_i32_0 = arith.constant 0 : i32
    %c0_i32_1 = arith.constant 0 : i32
    return %c0_i32, %c0_i32_0 : i32, i32
  }
  func.func @transform_5(%arg0: i32) -> (i32, i32) {
    %c0_i32 = arith.constant 0 : i32
    %c0_i32_0 = arith.constant 0 : i32
    return %arg0, %c0_i32 : i32, i32
  }
}

</mosaic_0001>

<bundles_post_ra>
// kernel: tpu_custom_call.1
= control target key start
LH: loop header
LB: loop body
LE: loop exit
PB: predicated region body
PF: predicated region fallthrough
CT: control target
= control target key end

     0   :  { %10 = vsyncpa [#allocation3], 0  ;;  %s2818_s0 = inlined_call_operand.vmem [shape: f32[256,32], index: 0, kind: input, shape index: {}]   ;;  %s2819_s1 = inlined_call_operand.vmem [shape: bf16[32,256], index: 1, kind: input, shape index: {}]   ;;  %s2820_s2 = inlined_call_operand.vmem [shape: f32[1,256], index: 2, kind: input, shape index: {}]   ;;  %s2821_s3 = inlined_call_operand.vmem [shape: bf16[128,512], index: 3, kind: input, shape index: {}]   ;;  %s2822_s4 = inlined_call_operand.vmem [shape: f32[1,512], index: 4, kind: input, shape index: {}]   ;;  %s2823_s5 = inlined_call_operand.hbm [shape: f32[256,128], index: 5, kind: output, shape index: {}]  }
   0x1   :  { %12 = vsyncpa [#allocation3 + $0x1], 0  ;;  %s1977_s18 = smov 0   ;;  %s1979_s19 = smov 0  }
   0x2   :  { %s1981_s20 = smov 0   ;;  %s1983_s21 = smov 0  }
   0x3 LB: > { %s1998_s22 = sadd.s32 4294967295, %s1938_s21   ;;  %s1606_s23 = sadd.s32 4294967294, %s1938_s21   ;;  %s1938_s21 = sphi %s1983_s21, %s2894_s21   ;;  %s1934_s20 = sphi %s1981_s20, %s2893_s20   ;;  %s1930_s19 = sphi %s1979_s19, %s2892_s19   ;;  %s1926_s18 = sphi %s1977_s18, %s2891_s18  }
   0x4   : > { %s2002_s24 = sadd.s32 1, %s1938_s21   ;;  %s135_s25 = sadd.s32 1, %s1934_s20 }
   0x5   : > { %s132_s26 = ssub.s32 %s1938_s21, %s2002_s24  ;;  %p145_p0 = scmp.ne.s32.totalorder %s1934_s20, %s1930_s19 }
   0x6   : > { %p133_p1 = scmp.eq.s32.totalorder %s132_s26, 0  ;;  %p146_p2 = scmp.eq.s32.totalorder %s1998_s22, 1 }
   0x7   : > { %p151_p3 = scmp.ne.s32.totalorder %s1930_s19, %s1926_s18  ;;  %p152_p4 = scmp.eq.s32.totalorder %s1606_s23, 1 }
   0x8   : > { %s2013_s27 = scalar_select %p133_p1, %s1934_s20, %s135_s25  }
   0x9   : > { %p2015_p5 = por %p146_p2, %p145_p0  ;;  %p2019_p6 = por %p152_p4, %p151_p3 }
   0xa   : > { %p1609_p7 = scmp.ge.s32.totalorder %s1938_s21, 1  ;;  %p191_p8 = scmp.lt.s32.totalorder %s1938_s21, 3 }
   0xc   : > { %p192_p9 = pnand %p1609_p7, %p191_p8 }
   0xe   : > { %195 = sbr.rel (%p192_p9) target bundleno = 879 (0x36f), region = 40 }
  0x15   : > { %v1758_v0 = vld [vmem:[%s2819_s1 + $0x4] ss:$8 sps:$4 sm:$0xff]   ;;  %s1611_s7 = sshll.u32 %s1998_s22, 4  ;;  %v1760_v1 = vld [vmem:[%s2819_s1] ss:$8 sps:$4 sm:$0xff]   ;;  %v2824_v2 = vmov 0   ;;  %v257_v61 = vlaneseq }
  0x16   : > { %344 = vmatprep.mubr.bf16.mxu0 %v2824_v2  ;;  %384 = vmatprep.mubr.bf16.mxu1 %v2824_v2  ;;  %p220_p10 = scmp.lt.s32.totalorder %s1611_s7, 31  ;;  %v1761_v3 = vld [vmem:[%s2819_s1 + $0x14] ss:$8 sps:$4 sm:$0xff]   ;;  %v1763_v4 = vld [vmem:[%s2819_s1 + $0x10] ss:$8 sps:$4 sm:$0xff]   ;;  %vm287_vm0 = vcmask 261120  }
  0x17   : > { %312 = vmatprep.subr.bf16.mxu0 %v1758_v0  ;;  %1663 = vmatprep.subr.bf16.mxu1 %v1758_v0  ;;  %v1766_v5 = vld [vmem:[%s2821_s3 + $0x4] ss:$16 sps:$4 sm:$0xff]   ;;  %v1769_v6 = vld [vmem:[%s2821_s3 + $0xc] ss:$16 sps:$4 sm:$0xff]   ;;  %v1764_v12 = vld [vmem:[%s2821_s3] ss:$16 sps:$4 sm:$0xff]  }
  0x18   : > { %313 = vmatpush1.bf16.msra.mxu0 %v1760_v1  ;;  %1665 = vmatpush1.bf16.msra.mxu1 %v1760_v1  ;;  %s2896_s7 = smov (!%p220_p10, %s1611_s7), 31  ;;  %v1767_v14 = vld [vmem:[%s2821_s3 + $0x8] ss:$16 sps:$4 sm:$0xff]   ;;  %v1772_v15 = vld [vmem:[%s2821_s3 + $0x24] ss:$16 sps:$4 sm:$0xff]   ;;  %v2175_v62 = vshrl.u32 %v257_v61, 7 }
  0x19   : > { %314 = vmatprep.subr.bf16.mxu0 %v1761_v3  ;;  %1664 = vmatprep.subr.bf16.mxu1 %v1761_v3  ;;  %s1612_s16 = sshll.u32 %s2896_s7, 3  ;;  %v1770_v16 = vld [vmem:[%s2821_s3 + $0x20] ss:$16 sps:$4 sm:$0xff]   ;;  %v1773_v21 = vld [vmem:[%s2821_s3 + $0x28] ss:$16 sps:$4 sm:$0xff]   ;;  %vm425_vm1 = vcmask 31744  }
  0x1a   : > { %1712 = vset.pattern.permute.xlu0 %v2824_v2  ;;  %1713 = vset.pattern.permute.xlu1 %v2824_v2  ;;  %s2051_s30 = scalar_lea.vmem %s2818_s0, %s1612_s16  ;;  %v1775_v22 = vld [vmem:[%s2821_s3 + $0x2c] ss:$16 sps:$4 sm:$0xff]   ;;  %v1778_v24 = vld [vmem:[%s2821_s3 + $0x44] ss:$16 sps:$4 sm:$0xff]   ;;  %v1776_v26 = vld [vmem:[%s2821_s3 + $0x40] ss:$16 sps:$4 sm:$0xff]  }
  0x1b   : > { %v227_v7 = vld [vmem:[%s2051_s30] sm:$0xff]  ;;  %v228_v8 = vld [vmem:[%s2051_s30 + $0x8] sm:$0xff]  ;;  %v229_v17 = vld [vmem:[%s2051_s30 + $0x10] sm:$0xff]  ;;  %v259_v63 = vsub.s32 0, %v2175_v62  ;;  %v263_v1 = vsub.s32 1, %v2175_v62  ;;  %s216_s8 = sand.u32 1, %s1930_s19  }
  0x1c   : > { %315 = vmatpush1.bf16.msra.mxu0 %v1763_v4  ;;  %1666 = vmatpush1.bf16.msra.mxu1 %v1763_v4  ;;  %v235_v9 = vld [vmem:[%s2051_s30 + $0x40] sm:$0xff]  ;;  %v243_v10 = vpack.c.bf16 %v228_v8, %v227_v7  ;;  %v236_v11 = vld [vmem:[%s2051_s30 + $0x48] sm:$0xff]  ;;  %v230_v18 = vld [vmem:[%s2051_s30 + $0x18] sm:$0xff]  ;;  %s1610_s9 = sshll.u32 %s216_s8, 7  ;;  %s1662_s11 = sshll.u32 %s1998_s22, 11 }
  0x1d   : > { %840 = vmatprep.subr.bf16.mxu1 %v1766_v5  ;;  %953 = vmatprep.subr.bf16.mxu0 %v1769_v6  ;;  %v247_v13 = vpack.c.bf16 %v236_v11, %v235_v9  ;;  %v237_v19 = vld [vmem:[%s2051_s30 + $0x50] sm:$0xff]  ;;  %v238_v20 = vld [vmem:[%s2051_s30 + $0x58] sm:$0xff]  ;;  %v244_v23 = vpack.c.bf16 %v230_v18, %v229_v17  ;;  %v231_v29 = vld [vmem:[%s2051_s30 + $0x20] sm:$0xff]  ;;  %s2671_s10 = scalar_lea.vmem [#allocation2], %s1610_s9  ;;  %s2770_s15 = scalar_lea.hbm %s2823_s5, %s1662_s11 }
  0x1e   : > { %v248_v25 = vpack.c.bf16 %v238_v20, %v237_v19  ;;  %v1781_v27 = vld [vmem:[%s2821_s3 + $0x4c] ss:$16 sps:$4 sm:$0xff]   ;;  %v1779_v28 = vld [vmem:[%s2821_s3 + $0x48] ss:$16 sps:$4 sm:$0xff]   ;;  %v1784_v31 = vld [vmem:[%s2821_s3 + $0x64] ss:$16 sps:$4 sm:$0xff]  }
  0x1f   : > { %1617 = vmatmul.mubr.msk.bf16.vlgmr.msra.gmra.mrb[0].mxu0 %vm287_vm0, %v243_v10  ;;  %1621 = vmatmul.mubr.msk.bf16.vlgmr.msra.gmra.mrb[0].mxu1 %vm287_vm0, %v247_v13  ;;  %v232_v30 = vld [vmem:[%s2051_s30 + $0x28] sm:$0xff]  ;;  %v239_v32 = vld [vmem:[%s2051_s30 + $0x60] sm:$0xff]  ;;  %v233_v45 = vld [vmem:[%s2051_s30 + $0x30] sm:$0xff]  ;;  %s1544_s12 = sshll.u32 %s2671_s10, 4  ;;  %s2777_s16 = scalar_lea.sflag [#allocation3], %s216_s8  ;;  %s2772_s12 = int_to_ptr.vmem [resolvable:$true] %s1544_s12 }
  0x20   : > { %354 = vmatprep.mubr.bf16.mxu0 %v2824_v2  ;;  %394 = vmatprep.mubr.bf16.mxu1 %v2824_v2  ;;  %v1787_v33 = vld [vmem:[%s2821_s3 + $0x6c] ss:$16 sps:$4 sm:$0xff]   ;;  %v1782_v35 = vld [vmem:[%s2821_s3 + $0x60] ss:$16 sps:$4 sm:$0xff]   ;;  %v1785_v36 = vld [vmem:[%s2821_s3 + $0x68] ss:$16 sps:$4 sm:$0xff]   ;;  %v245_v38 = vpack.c.bf16 %v232_v30, %v231_v29 }
  0x21   : > { %841 = vmatpush1.bf16.msra.mxu1 %v1764_v12  ;;  %954 = vmatpush1.bf16.msra.mxu0 %v1767_v14  ;;  %v240_v34 = vld [vmem:[%s2051_s30 + $0x68] sm:$0xff]  ;;  %v1790_v37 = vld [vmem:[%s2821_s3 + $0x84] ss:$16 sps:$4 sm:$0xff]   ;;  %v1788_v39 = vld [vmem:[%s2821_s3 + $0x80] ss:$16 sps:$4 sm:$0xff]   ;;  %s1876_s22 = scalar_lea.vmem %s2772_s12, 2048 }
  0x22   : > { %842 = vmatprep.subr.bf16.mxu1 %v1772_v15  ;;  %955 = vmatprep.subr.bf16.mxu0 %v1775_v22  ;;  %v1793_v40 = vld [vmem:[%s2821_s3 + $0x8c] ss:$16 sps:$4 sm:$0xff]   ;;  %v249_v41 = vpack.c.bf16 %v240_v34, %v239_v32  ;;  %v1791_v42 = vld [vmem:[%s2821_s3 + $0x88] ss:$16 sps:$4 sm:$0xff]   ;;  %v1796_v43 = vld [vmem:[%s2821_s3 + $0xa4] ss:$16 sps:$4 sm:$0xff]   ;;  %p1877_p11 = scmp.ne.s32.totalorder %s2772_s12, %s1876_s22 }
  0x23   : > { %v1799_v44 = vld [vmem:[%s2821_s3 + $0xac] ss:$16 sps:$4 sm:$0xff]   ;;  %v241_v47 = vld [vmem:[%s2051_s30 + $0x70] sm:$0xff]  ;;  %v1797_v50 = vld [vmem:[%s2821_s3 + $0xa8] ss:$16 sps:$4 sm:$0xff]   ;;  %s1944_s17 = smov [#allocation2]  }
  0x24   : > { %v234_v46 = vld [vmem:[%s2051_s30 + $0x38] sm:$0xff]  ;;  %v1794_v49 = vld [vmem:[%s2821_s3 + $0xa0] ss:$16 sps:$4 sm:$0xff]   ;;  %v1802_v53 = vld [vmem:[%s2821_s3 + $0xc4] ss:$16 sps:$4 sm:$0xff]   ;;  %p1878_p12 = pnand %p1877_p11, %p2015_p5  ;;  %s1880_s23 = sshll.u32 %s1944_s17, 4  ;;  %s1881_s23 = int_to_ptr.vmem [resolvable:$false] %s1880_s23 }
  0x25   : > { %843 = vmatpush1.bf16.msra.mxu1 %v1770_v16  ;;  %956 = vmatpush1.bf16.msra.mxu0 %v1773_v21  ;;  %v242_v48 = vld [vmem:[%s2051_s30 + $0x78] sm:$0xff]  ;;  %v246_v51 = vpack.c.bf16 %v234_v46, %v233_v45  ;;  %v1800_v55 = vld [vmem:[%s2821_s3 + $0xc0] ss:$16 sps:$4 sm:$0xff]   ;;  %v1808_v57 = vld [vmem:[%s2821_s3 + $0xe4] ss:$16 sps:$4 sm:$0xff]   ;;  %s1882_s25 = scalar_lea.vmem %s1881_s23, 4096  ;;  %p1883_p0 = scmp.lt.s32.totalorder %s2772_s12, %s1881_s23 }
  0x26   : > { %844 = vmatprep.subr.bf16.mxu1 %v1778_v24  ;;  %957 = vmatprep.subr.bf16.mxu0 %v1781_v27  ;;  %v250_v52 = vpack.c.bf16 %v242_v48, %v241_v47  ;;  %v1805_v54 = vld [vmem:[%s2821_s3 + $0xcc] ss:$16 sps:$4 sm:$0xff]   ;;  %v1803_v56 = vld [vmem:[%s2821_s3 + $0xc8] ss:$16 sps:$4 sm:$0xff]   ;;  %v1806_v59 = vld [vmem:[%s2821_s3 + $0xe0] ss:$16 sps:$4 sm:$0xff]   ;;  %p1879_p13 = pneg %p1878_p12  ;;  %p1884_p1 = scmp.lt.s32.totalorder %s1882_s25, %s1876_s22 }
  0x27   : > { %1618 = vmatmul.mubr.msk.bf16.gmra.mrb[4].mxu0 %vm287_vm0, %v244_v23  ;;  %1622 = vmatmul.mubr.msk.bf16.gmra.mrb[4].mxu1 %vm287_vm0, %v248_v25  ;;  %v1811_v58 = vld [vmem:[%s2821_s3 + $0xec] ss:$16 sps:$4 sm:$0xff]   ;;  %v1809_v60 = vld [vmem:[%s2821_s3 + $0xe8] ss:$16 sps:$4 sm:$0xff]   ;;  %v255_v0 = vld [vmem:[%s2820_s2] sm:$0x3] }
  0x28   : > { %364 = vmatprep.mubr.bf16.mxu0 %v2824_v2  ;;  %404 = vmatprep.mubr.bf16.mxu1 %v2824_v2  ;;  %v2184_v3 = vrot.slane %v255_v0, %v259_v63  ;;  %v2188_v4 = vrot.slane %v255_v0, %v263_v1  ;;  %p1885_p2 = por %p1884_p1, %p1883_p0 }
  0x29   : > { %845 = vmatpush1.bf16.msra.mxu1 %v1776_v26  ;;  %958 = vmatpush1.bf16.msra.mxu0 %v1779_v28 }
  0x2a   : > { %846 = vmatprep.subr.bf16.mxu1 %v1784_v31  ;;  %959 = vmatprep.subr.bf16.mxu0 %v1787_v33  ;;  %p1886_p3 = pnand %p1885_p2, %p1879_p13 }
  0x2d   : > { %847 = vmatpush1.bf16.msra.mxu1 %v1782_v35  ;;  %960 = vmatpush1.bf16.msra.mxu0 %v1785_v36 }
  0x2e   : > { %848 = vmatprep.subr.bf16.mxu1 %v1790_v37  ;;  %961 = vmatprep.subr.bf16.mxu0 %v1793_v40 }
  0x2f   : > { %1619 = vmatmul.mubr.msk.bf16.gmra.mrb[8].mxu0 %vm287_vm0, %v245_v38  ;;  %1623 = vmatmul.mubr.msk.bf16.gmra.mrb[8].mxu1 %vm287_vm0, %v249_v41 }
  0x30   : > { %374 = vmatprep.mubr.bf16.mxu0 %v2824_v2  ;;  %414 = vmatprep.mubr.bf16.mxu1 %v2824_v2 }
  0x31   : > { %849 = vmatpush1.bf16.msra.mxu1 %v1788_v39  ;;  %962 = vmatpush1.bf16.msra.mxu0 %v1791_v42 }
  0x32   : > { %850 = vmatprep.subr.bf16.mxu1 %v1796_v43  ;;  %963 = vmatprep.subr.bf16.mxu0 %v1799_v44 }
  0x35   : > { %851 = vmatpush1.bf16.msra.mxu1 %v1794_v49  ;;  %964 = vmatpush1.bf16.msra.mxu0 %v1797_v50 }
  0x36   : > { %852 = vmatprep.subr.bf16.mxu1 %v1802_v53  ;;  %965 = vmatprep.subr.bf16.mxu0 %v1805_v54 }
  0x37   : > { %1620 = vmatmul.mubr.msk.bf16.gmra.mrb[12].mxu0 %vm287_vm0, %v246_v51  ;;  %1624 = vmatmul.mubr.msk.bf16.gmra.mrb[12].mxu1 %vm287_vm0, %v250_v52 }
  0x38   : > { %985 = vmatprep.mubr.bf16.mxu0 %v2824_v2  ;;  %872 = vmatprep.mubr.bf16.mxu1 %v2824_v2 }
  0x39   : > { %853 = vmatpush1.bf16.msra.mxu1 %v1800_v55  ;;  %966 = vmatpush1.bf16.msra.mxu0 %v1803_v56 }
  0x3a   : > { %854 = vmatprep.subr.bf16.mxu1 %v1808_v57  ;;  %967 = vmatprep.subr.bf16.mxu0 %v1811_v58 }
  0x3d   : > { %855 = vmatpush1.bf16.msra.mxu1 %v1806_v59  ;;  %968 = vmatpush1.bf16.msra.mxu0 %v1809_v60 }
  0xf2   : > { %v346_v5 = vpop.f32.mrb[0].mxu0  ;;  %v386_v7 = vpop.f32.mrb[0].mxu1 }
  0xf3   : > { %v347_v6 = vadd.f32 %v346_v5, %v2184_v3  ;;  %v348_v8 = vpop.f32.mrb[1].mxu0  ;;  %v387_v9 = vadd.f32 %v386_v7, %v2184_v3  ;;  %v388_v11 = vpop.f32.mrb[1].mxu1 }
  0xf4   : > { %v2193_v10 = vadd.f32 %v348_v8, %v2188_v4  ;;  %v350_v12 = vpop.f32.mrb[2].mxu0  ;;  %v2196_v13 = vadd.f32 %v388_v11, %v2188_v4  ;;  %v390_v15 = vpop.f32.mrb[2].mxu1 }
  0xf5   : > { %v351_v14 = vadd.f32 %v350_v12, %v2184_v3  ;;  %v352_v16 = vpop.f32.mrb[3].mxu0  ;;  %v610_v17 = vmax.f32 %v387_v9, 0.0  ;;  %v391_v18 = vadd.f32 %v390_v15, %v2184_v3  ;;  %v392_v19 = vpop.f32.mrb[3].mxu1  ;;  %v602_v21 = vmax.f32 %v347_v6, 0.0 }
  0xf6   : > { %v426_v20 = vsel %vm425_vm1, %v2193_v10, -inf  ;;  %v2203_v23 = vadd.f32 %v392_v19, %v2188_v4  ;;  %v450_v25 = vsel %vm425_vm1, %v2196_v13, -inf  ;;  %v2208_v27 = vadd.f32 %v352_v16, %v2188_v4 }
  0xf7   : > { %v603_v22 = vmax.f32 %v351_v14, 0.0  ;;  %427 = vmax.xlane.f32.xlu0 %v426_v20  ;;  %v611_v24 = vmax.f32 %v391_v18, 0.0 }
  0xf8   : > { %v453_v28 = vsel %vm425_vm1, %v2203_v23, -inf  ;;  %v429_v42 = vsel %vm425_vm1, %v2208_v27, -inf }
  0xf9   : > { %v651_v26 = vpack.c.bf16 %v603_v22, %v602_v21  ;;  %v2212_v29 = vpack.c.bf16 %v611_v24, %v610_v17  ;;  %454 = vmax.xlane.f32.xlu1 %v453_v28 }
  0xfa   : > { %v356_v30 = vpop.f32.mrb[4].mxu0  ;;  %v396_v33 = vpop.f32.mrb[4].mxu1 }
  0xfb   : > { %v357_v31 = vadd.f32 %v356_v30, %v2184_v3  ;;  %v358_v32 = vpop.f32.mrb[5].mxu0  ;;  %451 = vmax.xlane.f32.xlu0 %v450_v25  ;;  %873 = vmatmul.mubr.bf16.vlgmr.msra.gmra.mrb[16].mxu1 %v651_v26  ;;  %v397_v36 = vadd.f32 %v396_v33, %v2184_v3  ;;  %v398_v37 = vpop.f32.mrb[5].mxu1 }
  0xfc   : > { %v2216_v34 = vadd.f32 %v358_v32, %v2188_v4  ;;  %986 = vmatmul.mubr.bf16.vlgmr.msra.gmra.mrb[16].mxu0 %v651_v26  ;;  %v360_v35 = vpop.f32.mrb[6].mxu0  ;;  %882 = vmatprep.mubr.bf16.mxu1 %v2824_v2  ;;  %v2222_v41 = vadd.f32 %v398_v37, %v2188_v4  ;;  %v400_v43 = vpop.f32.mrb[6].mxu1 }
  0xfd   : > { %v604_v38 = vmax.f32 %v357_v31, 0.0  ;;  %v361_v39 = vadd.f32 %v360_v35, %v2184_v3  ;;  %v362_v40 = vpop.f32.mrb[7].mxu0  ;;  %995 = vmatprep.mubr.bf16.mxu0 %v2824_v2  ;;  %v612_v44 = vmax.f32 %v397_v36, 0.0  ;;  %v401_v47 = vadd.f32 %v400_v43, %v2184_v3  ;;  %v402_v48 = vpop.f32.mrb[7].mxu1 }
  0xfe   : > { %v2228_v45 = vadd.f32 %v362_v40, %v2188_v4  ;;  %v432_v46 = vsel %vm425_vm1, %v2216_v34, -inf  ;;  %v2234_v51 = vadd.f32 %v402_v48, %v2188_v4  ;;  %v456_v53 = vsel %vm425_vm1, %v2222_v41, -inf }
  0xff   : > { %v605_v49 = vmax.f32 %v361_v39, 0.0  ;;  %433 = vmax.xlane.f32.xlu1 %v432_v46  ;;  %430 = vmax.xlane.f32.xlu0 %v429_v42  ;;  %v613_v50 = vmax.f32 %v401_v47, 0.0 }
 0x100   : > { %v435_v52 = vsel %vm425_vm1, %v2228_v45, -inf  ;;  %v459_v6 = vsel %vm425_vm1, %v2234_v51, -inf }
 0x101   : > { %v652_v54 = vpack.c.bf16 %v605_v49, %v604_v38  ;;  %v2240_v56 = vpack.c.bf16 %v613_v50, %v612_v44 }
 0x102   : > { %v366_v55 = vpop.f32.mrb[8].mxu0  ;;  %v406_v59 = vpop.f32.mrb[8].mxu1 }
 0x103   : > { %v367_v57 = vadd.f32 %v366_v55, %v2184_v3  ;;  %v368_v58 = vpop.f32.mrb[9].mxu0  ;;  %436 = vmax.xlane.f32.xlu1 %v435_v52  ;;  %457 = vmax.xlane.f32.xlu0 %v456_v53  ;;  %v407_v0 = vadd.f32 %v406_v59, %v2184_v3  ;;  %v408_v5 = vpop.f32.mrb[9].mxu1 }
 0x104   : > { %v2244_v60 = vadd.f32 %v368_v58, %v2188_v4  ;;  %883 = vmatmul.mubr.bf16.gmra.mrb[20].mxu1 %v652_v54  ;;  %996 = vmatmul.mubr.bf16.gmra.mrb[20].mxu0 %v652_v54  ;;  %v370_v61 = vpop.f32.mrb[10].mxu0  ;;  %v2251_v11 = vadd.f32 %v408_v5, %v2188_v4  ;;  %v410_v12 = vpop.f32.mrb[10].mxu1 }
 0x105   : > { %v606_v7 = vmax.f32 %v367_v57, 0.0  ;;  %v371_v8 = vadd.f32 %v370_v61, %v2184_v3  ;;  %v372_v9 = vpop.f32.mrb[11].mxu0  ;;  %892 = vmatprep.mubr.bf16.mxu1 %v2824_v2  ;;  %1005 = vmatprep.mubr.bf16.mxu0 %v2824_v2  ;;  %v614_v14 = vmax.f32 %v407_v0, 0.0  ;;  %v411_v17 = vadd.f32 %v410_v12, %v2184_v3  ;;  %v412_v18 = vpop.f32.mrb[11].mxu1 }
 0x106   : > { %v2256_v15 = vadd.f32 %v372_v9, %v2188_v4  ;;  %v438_v16 = vsel %vm425_vm1, %v2244_v60, -inf  ;;  %v2262_v21 = vadd.f32 %v412_v18, %v2188_v4  ;;  %v462_v24 = vsel %vm425_vm1, %v2251_v11, -inf }
 0x107   : > { %v607_v19 = vmax.f32 %v371_v8, 0.0  ;;  %460 = vmax.xlane.f32.xlu1 %v459_v6  ;;  %439 = vmax.xlane.f32.xlu0 %v438_v16  ;;  %v615_v20 = vmax.f32 %v411_v17, 0.0 }
 0x108   : > { %v441_v22 = vsel %vm425_vm1, %v2256_v15, -inf  ;;  %v465_v38 = vsel %vm425_vm1, %v2262_v21, -inf }
 0x109   : > { %v653_v25 = vpack.c.bf16 %v607_v19, %v606_v7  ;;  %v657_v28 = vpack.c.bf16 %v615_v20, %v614_v14 }
 0x10a   : > { %v376_v26 = vpop.f32.mrb[12].mxu0  ;;  %v416_v32 = vpop.f32.mrb[12].mxu1 }
 0x10b   : > { %v377_v30 = vadd.f32 %v376_v26, %v2184_v3  ;;  %v378_v31 = vpop.f32.mrb[13].mxu0  ;;  %442 = vmax.xlane.f32.xlu1 %v441_v22  ;;  %463 = vmax.xlane.f32.xlu0 %v462_v24  ;;  %v417_v36 = vadd.f32 %v416_v32, %v2184_v3  ;;  %v418_v37 = vpop.f32.mrb[13].mxu1 }
 0x10c   : > { %v2270_v33 = vadd.f32 %v378_v31, %v2188_v4  ;;  %893 = vmatmul.mubr.bf16.gmra.mrb[24].mxu1 %v653_v25  ;;  %1006 = vmatmul.mubr.bf16.gmra.mrb[24].mxu0 %v653_v25  ;;  %v380_v35 = vpop.f32.mrb[14].mxu0  ;;  %v2277_v43 = vadd.f32 %v418_v37, %v2188_v4  ;;  %v420_v44 = vpop.f32.mrb[14].mxu1 }
 0x10d   : > { %v608_v39 = vmax.f32 %v377_v30, 0.0  ;;  %v381_v40 = vadd.f32 %v380_v35, %v2184_v3  ;;  %v382_v42 = vpop.f32.mrb[15].mxu0  ;;  %902 = vmatprep.mubr.bf16.mxu1 %v2824_v2  ;;  %1015 = vmatprep.mubr.bf16.mxu0 %v2824_v2  ;;  %v616_v46 = vmax.f32 %v417_v36, 0.0  ;;  %v421_v49 = vadd.f32 %v420_v44, %v2184_v3  ;;  %v422_v50 = vpop.f32.mrb[15].mxu1 }
 0x10e   : > { %v2282_v47 = vadd.f32 %v382_v42, %v2188_v4  ;;  %v444_v48 = vsel %vm425_vm1, %v2270_v33, -inf  ;;  %v2288_v54 = vadd.f32 %v422_v50, %v2188_v4  ;;  %v468_v57 = vsel %vm425_vm1, %v2277_v43, -inf }
 0x10f   : > { %v609_v52 = vmax.f32 %v381_v40, 0.0  ;;  %466 = vmax.xlane.f32.xlu1 %v465_v38  ;;  %445 = vmax.xlane.f32.xlu0 %v444_v48  ;;  %v617_v53 = vmax.f32 %v421_v49, 0.0 }
 0x110   : > { %v447_v55 = vsel %vm425_vm1, %v2282_v47, -inf  ;;  %v471_v3 = vsel %vm425_vm1, %v2288_v54, -inf }
 0x111   : > { %v654_v58 = vpack.c.bf16 %v609_v52, %v608_v39  ;;  %v658_v59 = vpack.c.bf16 %v617_v53, %v616_v46 }
 0x113   : > { %448 = vmax.xlane.f32.xlu1 %v447_v55  ;;  %469 = vmax.xlane.f32.xlu0 %v468_v57 }
 0x114   : > { %903 = vmatmul.mubr.bf16.gmra.mrb[28].mxu1 %v654_v58  ;;  %1016 = vmatmul.mubr.bf16.gmra.mrb[28].mxu0 %v654_v58 }
 0x115   : > { %912 = vmatprep.mubr.bf16.mxu1 %v2824_v2  ;;  %1025 = vmatprep.mubr.bf16.mxu0 %v2824_v2 }
 0x117   : > { %472 = vmax.xlane.f32.xlu1 %v471_v3 }
 0x11c   : > { %913 = vmatmul.mubr.bf16.gmra.mrb[32].mxu1 %v2212_v29  ;;  %1026 = vmatmul.mubr.bf16.gmra.mrb[32].mxu0 %v2212_v29 }
 0x11d   : > { %922 = vmatprep.mubr.bf16.mxu1 %v2824_v2  ;;  %1035 = vmatprep.mubr.bf16.mxu0 %v2824_v2 }
 0x124   : > { %923 = vmatmul.mubr.bf16.gmra.mrb[36].mxu1 %v2240_v56  ;;  %1036 = vmatmul.mubr.bf16.gmra.mrb[36].mxu0 %v2240_v56 }
 0x125   : > { %932 = vmatprep.mubr.bf16.mxu1 %v2824_v2  ;;  %1045 = vmatprep.mubr.bf16.mxu0 %v2824_v2 }
 0x12c   : > { %933 = vmatmul.mubr.bf16.gmra.mrb[40].mxu1 %v657_v28  ;;  %1046 = vmatmul.mubr.bf16.gmra.mrb[40].mxu0 %v657_v28 }
 0x12d   : > { %942 = vmatprep.mubr.bf16.mxu1 %v2824_v2  ;;  %1055 = vmatprep.mubr.bf16.mxu0 %v2824_v2 }
 0x134   : > { %943 = vmatmul.mubr.bf16.gmra.mrb[44].mxu1 %v658_v59  ;;  %1056 = vmatmul.mubr.bf16.gmra.mrb[44].mxu0 %v658_v59 }
 0x184   : > { %v428_v4 = vpop.xlane.xlu0 %427 }
 0x185   : > { %v474_v29 = vsub.f32 %v2193_v10, %v428_v4 }
 0x186   : > { %v455_v0 = vpop.xlane.xlu1 %454 }
 0x187   : > { %v490_v61 = vmul.f32 1.442695, %v474_v29  ;;  %v483_v7 = vsub.f32 %v2203_v23, %v455_v0 }
 0x188   : > { %v452_v5 = vpop.xlane.xlu0 %451 }
 0x189   : > { %1812 = vpow2.f32 %v490_v61  ;;  %v482_v56 = vsub.f32 %v2196_v13, %v452_v5  ;;  %v508_v18 = vmul.f32 1.442695, %v483_v7 }
 0x18b   : > { %v506_v6 = vmul.f32 1.442695, %v482_v56 }
 0x18c   : > { %v434_v8 = vpop.xlane.xlu1 %433  ;;  %v431_v9 = vpop.xlane.xlu0 %430 }
 0x18d   : > { %1814 = vpow2.f32 %v506_v6  ;;  %v476_v12 = vsub.f32 %v2216_v34, %v434_v8  ;;  %v475_v14 = vsub.f32 %v2208_v27, %v431_v9 }
 0x18f   : > { %v494_v16 = vmul.f32 1.442695, %v476_v12  ;;  %v492_v17 = vmul.f32 1.442695, %v475_v14 }
 0x190   : > { %v437_v10 = vpop.xlane.xlu1 %436  ;;  %v458_v19 = vpop.xlane.xlu0 %457 }
 0x191   : > { %1816 = vpow2.f32 %v494_v16  ;;  %v477_v20 = vsub.f32 %v2228_v45, %v437_v10  ;;  %v484_v13 = vsub.f32 %v2222_v41, %v458_v19 }
 0x192   : > { %1818 = vpow2.f32 %v492_v17 }
 0x193   : > { %v2315_v22 = vpop.eup %1812  ;;  %v510_v23 = vmul.f32 1.442695, %v484_v13  ;;  %1820 = vpow2.f32 %v508_v18  ;;  %v496_v24 = vmul.f32 1.442695, %v477_v20 }
 0x194   : > { %v461_v25 = vpop.xlane.xlu1 %460  ;;  %v440_v34 = vpop.xlane.xlu0 %439  ;;  %v522_v27 = vsel %vm425_vm1, %v2315_v22, 0.0 }
 0x195   : > { %v485_v26 = vsub.f32 %v2234_v51, %v461_v25  ;;  %v478_v28 = vsub.f32 %v2244_v60, %v440_v34  ;;  %523 = vadd.xlane.f32.xlu0 %v522_v27  ;;  %1822 = vpow2.f32 %v510_v23 }
 0x196   : > { %1824 = vpow2.f32 %v496_v24 }
 0x197   : > { %v2321_v45 = vpop.eup %1814  ;;  %v498_v41 = vmul.f32 1.442695, %v478_v28  ;;  %v512_v30 = vmul.f32 1.442695, %v485_v26 }
 0x198   : > { %v443_v31 = vpop.xlane.xlu1 %442  ;;  %v464_v32 = vpop.xlane.xlu0 %463  ;;  %v546_v35 = vsel %vm425_vm1, %v2321_v45, 0.0 }
 0x199   : > { %v479_v36 = vsub.f32 %v2256_v15, %v443_v31  ;;  %v486_v37 = vsub.f32 %v2251_v11, %v464_v32  ;;  %547 = vadd.xlane.f32.xlu0 %v546_v35  ;;  %1826 = vpow2.f32 %v498_v41  ;;  %v670_v31 = vsub.s32 2, %v2175_v62  ;;  %v650_v32 = vld [vmem:[%s2822_s4] sm:$0xf] }
 0x19a   : > { %1828 = vpow2.f32 %v512_v30  ;;  %v674_v35 = vsub.s32 3, %v2175_v62 }
 0x19b   : > { %v2327_v51 = vpop.eup %1816  ;;  %v514_v60 = vmul.f32 1.442695, %v486_v37  ;;  %v500_v39 = vmul.f32 1.442695, %v479_v36 }
 0x19c   : > { %v2329_v38 = vpop.eup %1818  ;;  %v467_v40 = vpop.xlane.xlu1 %466  ;;  %v528_v44 = vsel %vm425_vm1, %v2327_v51, 0.0 }
 0x19d   : > { %v446_v42 = vpop.xlane.xlu0 %445  ;;  %v487_v46 = vsub.f32 %v2262_v21, %v467_v40  ;;  %529 = vadd.xlane.f32.xlu0 %v528_v44  ;;  %v525_v11 = vsel %vm425_vm1, %v2329_v38, 0.0  ;;  %v2337_v48 = vpop.eup %1820  ;;  %1830 = vpow2.f32 %v514_v60  ;;  %v2415_v60 = vrot.slane %v650_v32, %v259_v63 }
 0x19e   : > { %v480_v15 = vsub.f32 %v2270_v33, %v446_v42  ;;  %526 = vadd.xlane.f32.xlu1 %v525_v11  ;;  %1832 = vpow2.f32 %v500_v39  ;;  %v549_v33 = vsel %vm425_vm1, %v2337_v48, 0.0  ;;  %v2417_v39 = vrot.slane %v650_v32, %v670_v31 }
 0x19f   : > { %v2339_v50 = vpop.eup %1822  ;;  %v516_v52 = vmul.f32 1.442695, %v487_v46  ;;  %v2425_v44 = vrot.slane %v650_v32, %v263_v1  ;;  %v2427_v46 = vrot.slane %v650_v32, %v674_v35 }
 0x1a0   : > { %v502_v49 = vmul.f32 1.442695, %v480_v15  ;;  %v449_v53 = vpop.xlane.xlu1 %448  ;;  %v552_v58 = vsel %vm425_vm1, %v2339_v50, 0.0  ;;  %v2347_v59 = vpop.eup %1824 }
 0x1a1   : > { %v470_v55 = vpop.xlane.xlu0 %469  ;;  %v481_v57 = vsub.f32 %v2282_v47, %v449_v53  ;;  %553 = vadd.xlane.f32.xlu0 %v552_v58 }
 0x1a2   : > { %v488_v21 = vsub.f32 %v2277_v43, %v470_v55  ;;  %1834 = vpow2.f32 %v502_v49  ;;  %550 = vadd.xlane.f32.xlu1 %v549_v33  ;;  %v531_v43 = vsel %vm425_vm1, %v2347_v59, 0.0 }
 0x1a3   : > { %v2349_v4 = vpop.eup %1826  ;;  %1836 = vpow2.f32 %v516_v52  ;;  %v504_v29 = vmul.f32 1.442695, %v481_v57 }
 0x1a4   : > { %v518_v3 = vmul.f32 1.442695, %v488_v21  ;;  %v473_v61 = vpop.xlane.xlu1 %472  ;;  %v534_v0 = vsel %vm425_vm1, %v2349_v4, 0.0  ;;  %v2356_v5 = vpop.eup %1828 }
 0x1a5   : > { %v489_v47 = vsub.f32 %v2288_v54, %v473_v61  ;;  %535 = vadd.xlane.f32.xlu0 %v534_v0  ;;  %v555_v7 = vsel %vm425_vm1, %v2356_v5, 0.0 }
 0x1a6   : > { %1838 = vpow2.f32 %v518_v3  ;;  %532 = vadd.xlane.f32.xlu1 %v531_v43 }
 0x1a7   : > { %v2358_v56 = vpop.eup %1830  ;;  %1840 = vpow2.f32 %v504_v29  ;;  %v520_v6 = vmul.f32 1.442695, %v489_v47 }
 0x1a8   : > { %v558_v54 = vsel %vm425_vm1, %v2358_v56, 0.0  ;;  %v2364_v8 = vpop.eup %1832 }
 0x1a9   : > { %559 = vadd.xlane.f32.xlu0 %v558_v54  ;;  %1842 = vpow2.f32 %v520_v6  ;;  %v537_v12 = vsel %vm425_vm1, %v2364_v8, 0.0 }
 0x1aa   : > { %556 = vadd.xlane.f32.xlu1 %v555_v7 }
 0x1ac   : > { %v2366_v9 = vpop.eup %1834 }
 0x1ad   : > { %v540_v14 = vsel %vm425_vm1, %v2366_v9, 0.0  ;;  %v2372_v16 = vpop.eup %1836 }
 0x1ae   : > { %538 = vadd.xlane.f32.xlu1 %v537_v12  ;;  %541 = vadd.xlane.f32.xlu0 %v540_v14  ;;  %v561_v18 = vsel %vm425_vm1, %v2372_v16, 0.0 }
 0x1b0   : > { %v2374_v17 = vpop.eup %1838 }
 0x1b1   : > { %v564_v10 = vsel %vm425_vm1, %v2374_v17, 0.0  ;;  %v2380_v19 = vpop.eup %1840 }
 0x1b2   : > { %562 = vadd.xlane.f32.xlu1 %v561_v18  ;;  %565 = vadd.xlane.f32.xlu0 %v564_v10  ;;  %v543_v20 = vsel %vm425_vm1, %v2380_v19, 0.0 }
 0x1b3   : > { %v2384_v13 = vpop.eup %1842 }
 0x1b4   : > { %v567_v23 = vsel %vm425_vm1, %v2384_v13, 0.0 }
 0x1b6   : > { %544 = vadd.xlane.f32.xlu1 %v543_v20 }
 0x1ba   : > { %568 = vadd.xlane.f32.xlu1 %v567_v23 }
 0x1ce   : > { %v2388_v24 = vpop.f32.mrb[16].mxu1 }
 0x1cf   : > { %v2390_v25 = vpop.f32.mrb[16].mxu0  ;;  %v2392_v34 = vpop.f32.mrb[17].mxu1 }
 0x1d0   : > { %v2394_v27 = vpop.f32.mrb[17].mxu0  ;;  %v2396_v26 = vpop.f32.mrb[18].mxu1 }
 0x1d1   : > { %v2398_v28 = vpop.f32.mrb[18].mxu0  ;;  %v2400_v41 = vpop.f32.mrb[19].mxu1 }
 0x1d2   : > { %v2402_v30 = vpop.f32.mrb[19].mxu0 }
 0x1d7   : > { %v2409_v36 = vpop.f32.mrb[20].mxu1  ;;  %v2411_v37 = vpop.f32.mrb[20].mxu0 }
 0x1d8   : > { %v2419_v40 = vpop.f32.mrb[21].mxu1  ;;  %v2421_v42 = vpop.f32.mrb[21].mxu0 }
 0x1d9   : > { %v888_v15 = vpop.f32.mrb[22].mxu1  ;;  %v1001_v11 = vpop.f32.mrb[22].mxu0 }
 0x1da   : > { %v2430_v49 = vadd.f32 %v888_v15, %v2415_v60  ;;  %v2433_v63 = vadd.f32 %v1001_v11, %v2417_v39  ;;  %v890_v52 = vpop.f32.mrb[23].mxu1  ;;  %v1003_v53 = vpop.f32.mrb[23].mxu0 }
 0x1db   : > { %v2436_v55 = vadd.f32 %v890_v52, %v2425_v44  ;;  %v2439_v57 = vadd.f32 %v1003_v53, %v2427_v46 }
 0x1df   : > { %v894_v62 = vpop.f32.mrb[24].mxu1  ;;  %v1007_v1 = vpop.f32.mrb[24].mxu0 }
 0x1e0   : > { %v2442_v21 = vadd.f32 %v894_v62, %v2415_v60  ;;  %v2445_v33 = vadd.f32 %v1007_v1, %v2417_v39  ;;  %v896_v58 = vpop.f32.mrb[25].mxu1  ;;  %v1009_v3 = vpop.f32.mrb[25].mxu0 }
 0x1e1   : > { %v2448_v29 = vadd.f32 %v896_v58, %v2425_v44  ;;  %v2451_v61 = vadd.f32 %v1009_v3, %v2427_v46  ;;  %v898_v47 = vpop.f32.mrb[26].mxu1  ;;  %v1011_v43 = vpop.f32.mrb[26].mxu0 }
 0x1e2   : > { %2828 = vst [vmem:[#allocation5_spill] sm:$0xff] %v2442_v21  ;;  %2829 = vst [vmem:[#allocation6_spill] sm:$0xff] %v2445_v33  ;;  %v2454_v0 = vadd.f32 %v898_v47, %v2415_v60  ;;  %v2457_v6 = vadd.f32 %v1011_v43, %v2417_v39  ;;  %v900_v7 = vpop.f32.mrb[27].mxu1  ;;  %v1013_v54 = vpop.f32.mrb[27].mxu0 }
 0x1e3   : > { %2830 = vst [vmem:[#allocation7_spill] sm:$0xff] %v2448_v29  ;;  %2831 = vst [vmem:[#allocation8_spill] sm:$0xff] %v2451_v61  ;;  %v2460_v12 = vadd.f32 %v900_v7, %v2425_v44  ;;  %v2463_v14 = vadd.f32 %v1013_v54, %v2427_v46 }
 0x1e4   : > { %2832 = vst [vmem:[#allocation9_spill] sm:$0xff] %v2454_v0  ;;  %2833 = vst [vmem:[#allocation10_spill] sm:$0xff] %v2457_v6 }
 0x1e5   : > { %2834 = vst [vmem:[#allocation11_spill] sm:$0xff] %v2460_v12  ;;  %2835 = vst [vmem:[#allocation12_spill] sm:$0xff] %v2463_v14 }
 0x1e7   : > { %v904_v18 = vpop.f32.mrb[28].mxu1  ;;  %v1017_v10 = vpop.f32.mrb[28].mxu0 }
 0x1e8   : > { %v2466_v20 = vadd.f32 %v904_v18, %v2415_v60  ;;  %v2469_v23 = vadd.f32 %v1017_v10, %v2417_v39  ;;  %v906_v31 = vpop.f32.mrb[29].mxu1  ;;  %v1019_v32 = vpop.f32.mrb[29].mxu0 }
 0x1e9   : > { %v2472_v35 = vadd.f32 %v906_v31, %v2425_v44  ;;  %v2475_v15 = vadd.f32 %v1019_v32, %v2427_v46  ;;  %v908_v11 = vpop.f32.mrb[30].mxu1  ;;  %v1021_v52 = vpop.f32.mrb[30].mxu0 }
 0x1ea   : > { %2836 = vst [vmem:[#allocation13_spill] sm:$0xff] %v2466_v20  ;;  %2837 = vst [vmem:[#allocation14_spill] sm:$0xff] %v2469_v23  ;;  %v2478_v53 = vadd.f32 %v908_v11, %v2415_v60  ;;  %v2481_v62 = vadd.f32 %v1021_v52, %v2417_v39  ;;  %v910_v1 = vpop.f32.mrb[31].mxu1  ;;  %v1023_v58 = vpop.f32.mrb[31].mxu0 }
 0x1eb   : > { %2838 = vst [vmem:[#allocation15_spill] sm:$0xff] %v2472_v35  ;;  %2839 = vst [vmem:[#allocation16_spill] sm:$0xff] %v2475_v15  ;;  %v2484_v3 = vadd.f32 %v910_v1, %v2425_v44  ;;  %v2487_v47 = vadd.f32 %v1023_v58, %v2427_v46 }
 0x1ec   : > { %2840 = vst [vmem:[#allocation17_spill] sm:$0xff] %v2478_v53  ;;  %2841 = vst [vmem:[#allocation18_spill] sm:$0xff] %v2481_v62 }
 0x1ed   : > { %2842 = vst [vmem:[#allocation19_spill] sm:$0xff] %v2484_v3  ;;  %2843 = vst [vmem:[#allocation20_spill] sm:$0xff] %v2487_v47 }
 0x1ef   : > { %v2489_v43 = vpop.f32.mrb[32].mxu1  ;;  %v2491_v7 = vpop.f32.mrb[32].mxu0 }
 0x1f0   : > { %v2493_v54 = vpop.f32.mrb[33].mxu1  ;;  %v2495_v18 = vpop.f32.mrb[33].mxu0 }
 0x1f1   : > { %v2497_v10 = vpop.f32.mrb[34].mxu1  ;;  %v2499_v31 = vpop.f32.mrb[34].mxu0 }
 0x1f2   : > { %v2501_v32 = vpop.f32.mrb[35].mxu1  ;;  %v2503_v11 = vpop.f32.mrb[35].mxu0 }
 0x1f7   : > { %v2505_v52 = vpop.f32.mrb[36].mxu1  ;;  %v2507_v1 = vpop.f32.mrb[36].mxu0 }
 0x1f8   : > { %v2509_v58 = vpop.f32.mrb[37].mxu1  ;;  %v2511_v2 = vpop.f32.mrb[37].mxu0 }
 0x1f9   : > { %v928_v47 = vpop.f32.mrb[38].mxu1  ;;  %v1041_v62 = vpop.f32.mrb[38].mxu0 }
 0x1fa   : > { %v2514_v3 = vadd.f32 %v928_v47, %v2415_v60  ;;  %v2517_v53 = vadd.f32 %v1041_v62, %v2417_v39  ;;  %v930_v15 = vpop.f32.mrb[39].mxu1  ;;  %v1043_v23 = vpop.f32.mrb[39].mxu0 }
 0x1fb   : > { %v2520_v35 = vadd.f32 %v930_v15, %v2425_v44  ;;  %v2523_v20 = vadd.f32 %v1043_v23, %v2427_v46 }
 0x1fd   : > { %2844 = vst [vmem:[#allocation21_spill] sm:$0xff] %v2523_v20  ;;  %v1941_v20 = vmov 1  }
 0x1ff   : > { %v934_v14 = vpop.f32.mrb[40].mxu1  ;;  %v1047_v6 = vpop.f32.mrb[40].mxu0 }
 0x200   : > { %v2526_v12 = vadd.f32 %v934_v14, %v2415_v60  ;;  %v2529_v0 = vadd.f32 %v1047_v6, %v2417_v39  ;;  %v936_v47 = vpop.f32.mrb[41].mxu1  ;;  %v1049_v61 = vpop.f32.mrb[41].mxu0 }
 0x201   : > { %v2532_v62 = vadd.f32 %v936_v47, %v2425_v44  ;;  %v2535_v33 = vadd.f32 %v1049_v61, %v2427_v46  ;;  %v938_v15 = vpop.f32.mrb[42].mxu1  ;;  %v1051_v29 = vpop.f32.mrb[42].mxu0 }
 0x202   : > { %2845 = vst [vmem:[#allocation22_spill] sm:$0xff] %v2526_v12  ;;  %2846 = vst [vmem:[#allocation23_spill] sm:$0xff] %v2529_v0  ;;  %v2538_v23 = vadd.f32 %v938_v15, %v2415_v60  ;;  %v2541_v21 = vadd.f32 %v1051_v29, %v2417_v39  ;;  %v940_v14 = vpop.f32.mrb[43].mxu1  ;;  %v1053_v12 = vpop.f32.mrb[43].mxu0 }
 0x203   : > { %2847 = vst [vmem:[#allocation24_spill] sm:$0xff] %v2532_v62  ;;  %2848 = vst [vmem:[#allocation25_spill] sm:$0xff] %v2535_v33  ;;  %v2544_v6 = vadd.f32 %v940_v14, %v2425_v44  ;;  %v2547_v0 = vadd.f32 %v1053_v12, %v2427_v46 }
 0x204   : > { %2849 = vst [vmem:[#allocation26_spill] sm:$0xff] %v2538_v23  ;;  %2850 = vst [vmem:[#allocation27_spill] sm:$0xff] %v2541_v21 }
 0x205   : > { %2851 = vst [vmem:[#allocation28_spill] sm:$0xff] %v2544_v6  ;;  %2852 = vst [vmem:[#allocation29_spill] sm:$0xff] %v2547_v0 }
 0x207   : > { %v944_v47 = vpop.f32.mrb[44].mxu1  ;;  %v1057_v62 = vpop.f32.mrb[44].mxu0 }
 0x208   : > { %v2550_v61 = vadd.f32 %v944_v47, %v2415_v60  ;;  %v2553_v33 = vadd.f32 %v1057_v62, %v2417_v39  ;;  %v946_v15 = vpop.f32.mrb[45].mxu1  ;;  %v1059_v23 = vpop.f32.mrb[45].mxu0 }
 0x209   : > { %v2556_v29 = vadd.f32 %v946_v15, %v2425_v44  ;;  %v2559_v21 = vadd.f32 %v1059_v23, %v2427_v46  ;;  %v948_v14 = vpop.f32.mrb[46].mxu1  ;;  %v1061_v6 = vpop.f32.mrb[46].mxu0 }
 0x20a   : > { %2853 = vst [vmem:[#allocation30_spill] sm:$0xff] %v2550_v61  ;;  %2854 = vst [vmem:[#allocation31_spill] sm:$0xff] %v2553_v33  ;;  %v2562_v12 = vadd.f32 %v948_v14, %v2415_v60  ;;  %v2565_v0 = vadd.f32 %v1061_v6, %v2417_v39  ;;  %v950_v47 = vpop.f32.mrb[47].mxu1  ;;  %v1063_v61 = vpop.f32.mrb[47].mxu0 }
 0x20b   : > { %2855 = vst [vmem:[#allocation32_spill] sm:$0xff] %v2556_v29  ;;  %2856 = vst [vmem:[#allocation33_spill] sm:$0xff] %v2559_v21  ;;  %v2568_v62 = vadd.f32 %v950_v47, %v2425_v44  ;;  %v2571_v33 = vadd.f32 %v1063_v61, %v2427_v46  ;;  %v1942_v61 = vmov 2  }
 0x20c   : > { %2857 = vst [vmem:[#allocation34_spill] sm:$0xff] %v2562_v12  ;;  %2858 = vst [vmem:[#allocation35_spill] sm:$0xff] %v2565_v0 }
 0x222   : > { %v524_v15 = vpop.xlane.xlu0 %523 }
 0x223   : > { %1844 = vrcp.f32 %v524_v15 }
 0x226   : > { %v548_v23 = vpop.xlane.xlu0 %547 }
 0x227   : > { %1846 = vrcp.f32 %v548_v23 }
 0x22b   : > { %v527_v21 = vpop.xlane.xlu1 %526 }
 0x22d   : > { %v1845_v29 = vpop.eup %1844 }
 0x22e   : > { %v586_v14 = vmul.f32 %v1845_v29, %v2315_v22  ;;  %v1943_v22 = vmov 3   ;;  %v530_v29 = vpop.xlane.xlu0 %529 }
 0x22f   : > { %v551_v6 = vpop.xlane.xlu1 %550 }
 0x230   : > { %1132 = vperm.xlu0 %1712, %v586_v14   ;;  %1848 = vrcp.f32 %v551_v6 }
 0x231   : > { %v1847_v12 = vpop.eup %1846  ;;  %1850 = vrcp.f32 %v527_v21  ;;  %v2859_v21 = vmov 0  }
 0x232   : > { %v594_v0 = vmul.f32 %v1847_v12, %v2321_v45  ;;  %v554_v15 = vpop.xlane.xlu0 %553 }
 0x233   : > { %1852 = vrcp.f32 %v554_v15 }
 0x234   : > { %1715 = vset.pattern.permute.xlu0 %v1941_v20  ;;  %1172 = vperm.xlu1 %1713, %v594_v0   ;;  %1854 = vrcp.f32 %v530_v29 }
 0x235   : > { %1259 = vperm.xlu0 %1715, %v594_v0  }
 0x236   : > { %v536_v29 = vpop.xlane.xlu0 %535 }
 0x238   : > { %1714 = vset.pattern.permute.xlu1 %v1941_v20 }
 0x239   : > { %1716 = vset.pattern.permute.xlu0 %v1942_v61  ;;  %1227 = vperm.xlu1 %1714, %v586_v14  }
 0x23a   : > { %1323 = vperm.xlu0 %1716, %v586_v14   ;;  %v1849_v45 = vpop.eup %1848 }
 0x23b   : > { %v595_v12 = vmul.f32 %v1849_v45, %v2337_v48  ;;  %v1851_v47 = vpop.eup %1850 }
 0x23c   : > { %v587_v23 = vmul.f32 %v1851_v47, %v2329_v38 }
 0x23d   : > { %1717 = vset.pattern.permute.xlu1 %v1942_v61  ;;  %v1853_v38 = vpop.eup %1852 }
 0x23e   : > { %1719 = vset.pattern.permute.xlu0 %v1943_v22  ;;  %1355 = vperm.xlu1 %1717, %v594_v0   ;;  %v1855_v6 = vpop.eup %1854 }
 0x23f   : > { %1451 = vperm.xlu0 %1719, %v594_v0   ;;  %v533_v0 = vpop.xlane.xlu1 %532  ;;  %v588_v45 = vmul.f32 %v1855_v6, %v2327_v51 }
 0x242   : > { %1718 = vset.pattern.permute.xlu1 %v1943_v22 }
 0x243   : > { %1721 = vset.pattern.permute.xlu0 %v2859_v21  ;;  %1419 = vperm.xlu1 %1718, %v586_v14   ;;  %v557_v48 = vpop.xlane.xlu1 %556  ;;  %v596_v14 = vmul.f32 %v1853_v38, %v2339_v50 }
 0x244   : > { %1177 = vperm.xlu0 %1721, %v595_v12   ;;  %1856 = vrcp.f32 %v557_v48 }
 0x245   : > { %1858 = vrcp.f32 %v533_v0 }
 0x246   : > { %1860 = vrcp.f32 %v536_v29 }
 0x247   : > { %1720 = vset.pattern.permute.xlu1 %v2859_v21 }
 0x248   : > { %1722 = vset.pattern.permute.xlu0 %v1941_v20  ;;  %1137 = vperm.xlu1 %1720, %v587_v23  }
 0x249   : > { %1231 = vperm.xlu0 %1722, %v587_v23  }
 0x24c   : > { %1723 = vset.pattern.permute.xlu1 %v1941_v20 }
 0x24d   : > { %1725 = vset.pattern.permute.xlu0 %v1942_v61  ;;  %1263 = vperm.xlu1 %1723, %v595_v12  }
 0x24e   : > { %1359 = vperm.xlu0 %1725, %v595_v12   ;;  %v1857_v47 = vpop.eup %1856 }
 0x24f   : > { %v597_v15 = vmul.f32 %v1857_v47, %v2356_v5  ;;  %v1859_v50 = vpop.eup %1858 }
 0x250   : > { %v589_v51 = vmul.f32 %v1859_v50, %v2347_v59  ;;  %v1861_v5 = vpop.eup %1860 }
 0x251   : > { %1724 = vset.pattern.permute.xlu1 %v1942_v61  ;;  %v590_v0 = vmul.f32 %v1861_v5, %v2349_v4 }
 0x252   : > { %1726 = vset.pattern.permute.xlu0 %v1943_v22  ;;  %1327 = vperm.xlu1 %1724, %v587_v23  }
 0x253   : > { %1423 = vperm.xlu0 %1726, %v587_v23   ;;  %v539_v23 = vpop.xlane.xlu1 %538 }
 0x256   : > { %1727 = vset.pattern.permute.xlu1 %v1943_v22 }
 0x257   : > { %1730 = vset.pattern.permute.xlu0 %v1941_v20  ;;  %1455 = vperm.xlu1 %1727, %v595_v12   ;;  %v560_v12 = vpop.xlane.xlu0 %559  ;;  %v563_v38 = vpop.xlane.xlu1 %562 }
 0x258   : > { %1267 = vperm.xlu0 %1730, %v596_v14   ;;  %1862 = vrcp.f32 %v560_v12 }
 0x259   : > { %1864 = vrcp.f32 %v563_v38  ;;  %v877_v38 = vadd.f32 %v2392_v34, %v2425_v44 }
 0x25a   : > { %1866 = vrcp.f32 %v539_v23 }
 0x25b   : > { %1728 = vset.pattern.permute.xlu1 %v2859_v21  ;;  %v542_v4 = vpop.xlane.xlu0 %541  ;;  %v545_v47 = vpop.xlane.xlu1 %544 }
 0x25c   : > { %1142 = vperm.xlu1 %1728, %v588_v45   ;;  %1733 = vset.pattern.permute.xlu0 %v1943_v22  ;;  %1868 = vrcp.f32 %v542_v4 }
 0x25d   : > { %1459 = vperm.xlu0 %1733, %v596_v14  }
 0x260   : > { %1182 = vperm.xlu1 %1728, %v596_v14  }
 0x261   : > { %1735 = vset.pattern.permute.xlu0 %v2859_v21 }
 0x262   : > { %1187 = vperm.xlu0 %1735, %v597_v15   ;;  %v1863_v48 = vpop.eup %1862 }
 0x263   : > { %v598_v59 = vmul.f32 %v1863_v48, %v2358_v56  ;;  %v875_v48 = vadd.f32 %v2388_v24, %v2415_v60  ;;  %v1028_v24 = vadd.f32 %v2491_v7, %v2417_v39 }
 0x264   : > { %1729 = vset.pattern.permute.xlu1 %v1941_v20 }
 0x265   : > { %1235 = vperm.xlu1 %1729, %v588_v45  }
 0x266   : > { %1737 = vset.pattern.permute.xlu0 %v1942_v61 }
 0x267   : > { %1335 = vperm.xlu0 %1737, %v589_v51  }
 0x269   : > { %1731 = vset.pattern.permute.xlu1 %v1942_v61 }
 0x26a   : > { %1331 = vperm.xlu1 %1731, %v588_v45  }
 0x26b   : > { %1367 = vperm.xlu0 %1737, %v597_v15  }
 0x26e   : > { %1363 = vperm.xlu1 %1731, %v596_v14   ;;  %v1865_v14 = vpop.eup %1864 }
 0x26f   : > { %1740 = vset.pattern.permute.xlu0 %v1941_v20  ;;  %v599_v6 = vmul.f32 %v1865_v14, %v2372_v16  ;;  %v1867_v56 = vpop.eup %1866  ;;  %v569_v16 = vpop.xlane.xlu1 %568 }
 0x270   : > { %1243 = vperm.xlu0 %1740, %v590_v0   ;;  %v591_v29 = vmul.f32 %v1867_v56, %v2364_v8  ;;  %v1869_v50 = vpop.eup %1868 }
 0x271   : > { %v2616_v12 = vmul.f32 %v1869_v50, %v2366_v9 }
 0x272   : > { %1732 = vset.pattern.permute.xlu1 %v1943_v22 }
 0x273   : > { %1427 = vperm.xlu1 %1732, %v588_v45   ;;  %v566_v45 = vpop.xlane.xlu0 %565 }
 0x274   : > { %1275 = vperm.xlu0 %1740, %v598_v59   ;;  %1870 = vrcp.f32 %v566_v45 }
 0x275   : > { %1872 = vrcp.f32 %v569_v16 }
 0x276   : > { %1874 = vrcp.f32 %v545_v47 }
 0x277   : > { %1734 = vset.pattern.permute.xlu1 %v2859_v21 }
 0x278   : > { %1147 = vperm.xlu1 %1734, %v589_v51   ;;  %1742 = vset.pattern.permute.xlu0 %v1943_v22 }
 0x279   : > { %1435 = vperm.xlu0 %1742, %v590_v0  }
 0x27c   : > { %1736 = vset.pattern.permute.xlu1 %v1941_v20 }
 0x27d   : > { %1239 = vperm.xlu1 %1736, %v589_v51   ;;  %1467 = vperm.xlu0 %1742, %v598_v59  }
 0x27e   : > { %v1871_v23 = vpop.eup %1870 }
 0x27f   : > { %v2621_v8 = vmul.f32 %v1871_v23, %v2374_v17  ;;  %v1873_v9 = vpop.eup %1872 }
 0x280   : > { %v1875_v17 = vpop.eup %1874 }
 0x281   : > { %1271 = vperm.xlu1 %1736, %v597_v15   ;;  %1744 = vset.pattern.permute.xlu0 %v2859_v21 }
 0x282   : > { %1197 = vperm.xlu0 %1744, %v599_v6  }
 0x285   : > { %1738 = vset.pattern.permute.xlu1 %v1943_v22 }
 0x286   : > { %1431 = vperm.xlu1 %1738, %v589_v51   ;;  %1746 = vset.pattern.permute.xlu0 %v1942_v61  ;;  %v2634_v51 = vmul.f32 %v1875_v17, %v2380_v19  ;;  %v917_v19 = vadd.f32 %v2493_v54, %v2425_v44  ;;  %v1066_v54 = vmax.f32 %v875_v48, 0.0 }
 0x287   : > { %1343 = vperm.xlu0 %1746, %v591_v29  }
 0x28a   : > { %1463 = vperm.xlu1 %1738, %v597_v15   ;;  %v2628_v15 = vmul.f32 %v1873_v9, %v2384_v13  ;;  %v915_v13 = vadd.f32 %v2489_v43, %v2415_v60  ;;  %v988_v43 = vadd.f32 %v2390_v25, %v2417_v39  ;;  %v1030_v25 = vadd.f32 %v2495_v18, %v2427_v46 }
 0x28b   : > { %1375 = vperm.xlu0 %1746, %v599_v6  }
 0x28c   : > { %v1068_v50 = vmax.f32 %v988_v43, 0.0  ;;  %v1101_v7 = vmax.f32 %v1030_v25, 0.0  ;;  %v879_v43 = vadd.f32 %v2396_v26, %v2415_v60  ;;  %v919_v26 = vadd.f32 %v2497_v10, %v2415_v60 }
 0x28d   : > { %v992_v10 = vadd.f32 %v2398_v28, %v2417_v39  ;;  %v1034_v28 = vadd.f32 %v2503_v11, %v2427_v46 }
 0x28e   : > { %1739 = vset.pattern.permute.xlu1 %v2859_v21 }
 0x28f   : > { %1152 = vperm.xlu1 %1739, %v590_v0   ;;  %1749 = vset.pattern.permute.xlu0 %v1941_v20 }
 0x290   : > { %1251 = vperm.xlu0 %1749, %v2616_v12  }
 0x293   : > { %1192 = vperm.xlu1 %1739, %v598_v59  }
 0x294   : > { %1283 = vperm.xlu0 %1749, %v2621_v8  }
 0x297   : > { %1741 = vset.pattern.permute.xlu1 %v1942_v61 }
 0x298   : > { %1339 = vperm.xlu1 %1741, %v590_v0   ;;  %1751 = vset.pattern.permute.xlu0 %v1943_v22  ;;  %v1098_v0 = vmax.f32 %v915_v13, 0.0  ;;  %v1100_v13 = vmax.f32 %v1028_v24, 0.0 }
 0x299   : > { %1443 = vperm.xlu0 %1751, %v2616_v12  }
 0x29c   : > { %1371 = vperm.xlu1 %1741, %v598_v59   ;;  %v1099_v59 = vmax.f32 %v917_v19, 0.0  ;;  %v990_v19 = vadd.f32 %v2394_v27, %v2427_v46  ;;  %v881_v27 = vadd.f32 %v2400_v41, %v2425_v44 }
 0x29d   : > { %1753 = vset.pattern.permute.xlu0 %v2859_v21 }
 0x29e   : > { %1207 = vperm.xlu0 %1753, %v2628_v15  }
 0x2a0   : > { %1743 = vset.pattern.permute.xlu1 %v2859_v21 }
 0x2a1   : > { %1157 = vperm.xlu1 %1743, %v591_v29  }
 0x2a2   : > { %1755 = vset.pattern.permute.xlu0 %v1942_v61 }
 0x2a3   : > { %1351 = vperm.xlu0 %1755, %v2634_v51  }
 0x2a5   : > { %1745 = vset.pattern.permute.xlu1 %v1941_v20 }
 0x2a6   : > { %1247 = vperm.xlu1 %1745, %v591_v29  }
 0x2a7   : > { %1383 = vperm.xlu0 %1755, %v2628_v15  }
 0x2aa   : > { %1279 = vperm.xlu1 %1745, %v599_v6  }
 0x2ab   : > { %1757 = vset.pattern.permute.xlu0 %v1943_v22 }
 0x2ac   : > { %1475 = vperm.xlu0 %1757, %v2621_v8  }
 0x2ae   : > { %1747 = vset.pattern.permute.xlu1 %v1943_v22 }
 0x2af   : > { %1439 = vperm.xlu1 %1747, %v591_v29   ;;  %v1133_v5 = vpop.permute.xlu0 %1132  ;;  %v1067_v29 = vmax.f32 %v877_v38, 0.0 }
 0x2b3   : > { %v1173_v4 = vpop.permute.xlu1 %1172  ;;  %1471 = vperm.xlu1 %1747, %v599_v6   ;;  %v1210_v6 = vmul.f32 %v1133_v5, %v1066_v54 }
 0x2b4   : > { %v1218_v14 = vmul.f32 %v1173_v4, %v1098_v0  ;;  %v1260_v56 = vpop.permute.xlu0 %1259  ;;  %v1069_v4 = vmax.f32 %v990_v19, 0.0 }
 0x2b5   : > { %v1298_v45 = vmul.f32 %v1260_v56, %v1099_v59 }
 0x2b7   : > { %v1314_v47 = vadd.f32 %v1298_v45, %v1218_v14  ;;  %1748 = vset.pattern.permute.xlu1 %v2859_v21 }
 0x2b8   : > { %v1228_v34 = vpop.permute.xlu1 %1227  ;;  %1162 = vperm.xlu1 %1748, %v2616_v12  }
 0x2b9   : > { %v1290_v16 = vmul.f32 %v1228_v34, %v1067_v29  ;;  %v1324_v23 = vpop.permute.xlu0 %1323 }
 0x2ba   : > { %v1386_v9 = vmul.f32 %v1324_v23, %v1068_v50  ;;  %v1032_v50 = vadd.f32 %v2499_v31, %v2417_v39 }
 0x2bb   : > { %v1306_v17 = vadd.f32 %v1290_v16, %v1210_v6 }
 0x2bc   : > { %1202 = vperm.xlu1 %1748, %v2621_v8   ;;  %v1104_v23 = vmax.f32 %v1032_v50, 0.0 }
 0x2bd   : > { %v1402_v0 = vadd.f32 %v1386_v9, %v1306_v17  ;;  %v1356_v48 = vpop.permute.xlu1 %1355  ;;  %v994_v9 = vadd.f32 %v2402_v30, %v2427_v46 }
 0x2be   : > { %v1394_v38 = vmul.f32 %v1356_v48, %v1100_v13  ;;  %v1452_v59 = vpop.permute.xlu0 %1451 }
 0x2bf   : > { %v1490_v18 = vmul.f32 %v1452_v59, %v1101_v7  ;;  %v1072_v7 = vmax.f32 %v992_v10, 0.0 }
 0x2c0   : > { %v1410_v5 = vadd.f32 %v1394_v38, %v1314_v47  ;;  %1750 = vset.pattern.permute.xlu1 %v1942_v61  ;;  %v1070_v61 = vmax.f32 %v879_v43, 0.0  ;;  %v921_v47 = vadd.f32 %v2501_v32, %v2425_v44 }
 0x2c1   : > { %1347 = vperm.xlu1 %1750, %v2616_v12   ;;  %v1071_v12 = vmax.f32 %v881_v27, 0.0  ;;  %v925_v27 = vadd.f32 %v2505_v52, %v2415_v60 }
 0x2c2   : > { %v1506_v14 = vadd.f32 %v1490_v18, %v1410_v5  ;;  %v1420_v56 = vpop.permute.xlu1 %1419  ;;  %v1103_v6 = vmax.f32 %v921_v47, 0.0 }
 0x2c3   : > { %v1482_v45 = vmul.f32 %v1420_v56, %v1069_v4  ;;  %v1178_v54 = vpop.permute.xlu0 %1177  ;;  %v1105_v4 = vmax.f32 %v1034_v28, 0.0 }
 0x2c4   : > { %1522 = vst [vmem:[%s2671_s10 + $0x40] sm:$0xff] %v1506_v14 }
 0x2c5   : > { %v1498_v29 = vadd.f32 %v1482_v45, %v1402_v0  ;;  %1379 = vperm.xlu1 %1750, %v2621_v8   ;;  %v1102_v8 = vmax.f32 %v919_v26, 0.0  ;;  %v1073_v0 = vmax.f32 %v994_v9, 0.0  ;;  %v927_v45 = vadd.f32 %v2509_v58, %v2425_v44 }
 0x2c6   : > { %v998_v58 = vadd.f32 %v2411_v37, %v2417_v39  ;;  %v1000_v37 = vadd.f32 %v2421_v42, %v2427_v46 }
 0x2c7   : > { %1514 = vst [vmem:[%s2671_s10] sm:$0xff] %v1498_v29  ;;  %v1138_v41 = vpop.permute.xlu1 %1137  ;;  %v1219_v17 = vmul.f32 %v1178_v54, %v1102_v8  ;;  %v1106_v29 = vmax.f32 %v925_v27, 0.0 }
 0x2c8   : > { %v1211_v24 = vmul.f32 %v1138_v41, %v1070_v61  ;;  %v1232_v34 = vpop.permute.xlu0 %1231  ;;  %v1107_v61 = vmax.f32 %v927_v45, 0.0 }
 0x2c9   : > { %v1291_v25 = vmul.f32 %v1232_v34, %v1071_v12  ;;  %1752 = vset.pattern.permute.xlu1 %v2859_v21 }
 0x2ca   : > { %1167 = vperm.xlu1 %1752, %v2634_v51  }
 0x2cb   : > { %v1307_v16 = vadd.f32 %v1291_v25, %v1211_v24 }
 0x2cc   : > { %v1264_v32 = vpop.permute.xlu1 %1263 }
 0x2cd   : > { %v1299_v31 = vmul.f32 %v1264_v32, %v1103_v6  ;;  %v1360_v13 = vpop.permute.xlu0 %1359 }
 0x2ce   : > { %v1395_v19 = vmul.f32 %v1360_v13, %v1104_v23  ;;  %1754 = vset.pattern.permute.xlu1 %v1941_v20 }
 0x2cf   : > { %v1315_v21 = vadd.f32 %v1299_v31, %v1219_v17  ;;  %1255 = vperm.xlu1 %1754, %v2634_v51  }
 0x2d1   : > { %v1411_v48 = vadd.f32 %v1395_v19, %v1315_v21  ;;  %v1328_v38 = vpop.permute.xlu1 %1327 }
 0x2d2   : > { %v1387_v59 = vmul.f32 %v1328_v38, %v1072_v7  ;;  %v1424_v30 = vpop.permute.xlu0 %1423  ;;  %v1078_v38 = vmax.f32 %v2430_v49, 0.0 }
 0x2d3   : > { %v1483_v18 = vmul.f32 %v1424_v30, %v1073_v0  ;;  %1287 = vperm.xlu1 %1754, %v2628_v15   ;;  %v1080_v30 = vmax.f32 %v2433_v63, 0.0  ;;  %v1081_v63 = vmax.f32 %v2439_v57, 0.0 }
 0x2d4   : > { %v1403_v5 = vadd.f32 %v1387_v59, %v1307_v16  ;;  %v1076_v16 = vmax.f32 %v998_v58, 0.0  ;;  %v1079_v59 = vmax.f32 %v2436_v55, 0.0 }
 0x2d6   : > { %v1499_v20 = vadd.f32 %v1483_v18, %v1403_v5  ;;  %v1456_v43 = vpop.permute.xlu1 %1455 }
 0x2d7   : > { %v1491_v14 = vmul.f32 %v1456_v43, %v1105_v4  ;;  %1756 = vset.pattern.permute.xlu1 %v1943_v22  ;;  %v1268_v56 = vpop.permute.xlu0 %1267  ;;  %v885_v22 = vadd.f32 %v2409_v36, %v2415_v60  ;;  %v1038_v36 = vadd.f32 %v2507_v1, %v2417_v39  ;;  %v1077_v39 = vmax.f32 %v1000_v37, 0.0  ;;  %v2865_v37 = vld [vmem:[#allocation6_spill] sm:$0xff] }
 0x2d8   : > { %1515 = vst [vmem:[%s2671_s10 + $0x8] sm:$0xff] %v1499_v20  ;;  %1447 = vperm.xlu1 %1756, %v2634_v51   ;;  %v887_v51 = vadd.f32 %v2419_v40, %v2425_v44  ;;  %v1300_v47 = vmul.f32 %v1268_v56, %v1107_v61  ;;  %v1040_v40 = vadd.f32 %v2511_v2, %v2427_v46  ;;  %v1110_v4 = vmax.f32 %v2514_v3, 0.0 }
 0x2d9   : > { %v1507_v11 = vadd.f32 %v1491_v14, %v1411_v48  ;;  %v1074_v50 = vmax.f32 %v885_v22, 0.0  ;;  %v1108_v23 = vmax.f32 %v1038_v36, 0.0  ;;  %v1111_v20 = vmax.f32 %v2520_v35, 0.0  ;;  %v2860_v22 = vld [vmem:[#allocation21_spill] sm:$0xff] }
 0x2da   : > { %v1075_v24 = vmax.f32 %v887_v51, 0.0  ;;  %v1109_v17 = vmax.f32 %v1040_v40, 0.0  ;;  %v1113_v35 = vmax.f32 %v2860_v22, 0.0 }
 0x2db   : > { %1523 = vst [vmem:[%s2671_s10 + $0x48] sm:$0xff] %v1507_v11  ;;  %v1143_v54 = vpop.permute.xlu1 %1142  ;;  %v1112_v11 = vmax.f32 %v2517_v53, 0.0 }
 0x2dc   : > { %1479 = vperm.xlu1 %1756, %v2628_v15   ;;  %v1460_v12 = vpop.permute.xlu0 %1459  ;;  %v1212_v25 = vmul.f32 %v1143_v54, %v1074_v50 }
 0x2dd   : > { %v1492_v13 = vmul.f32 %v1460_v12, %v1109_v17 }
 0x2df   : > { %v1183_v26 = vpop.permute.xlu1 %1182 }
 0x2e0   : > { %v1220_v41 = vmul.f32 %v1183_v26, %v1106_v29 }
 0x2e1   : > { %v1188_v34 = vpop.permute.xlu0 %1187 }
 0x2e2   : > { %v1316_v52 = vadd.f32 %v1300_v47, %v1220_v41  ;;  %v1221_v27 = vmul.f32 %v1188_v34, %v1110_v4  ;;  %v2869_v4 = vld [vmem:[#allocation9_spill] sm:$0xff] }
 0x2e4   : > { %v1236_v15 = vpop.permute.xlu1 %1235 }
 0x2e5   : > { %v1292_v8 = vmul.f32 %v1236_v15, %v1075_v24  ;;  %v2862_v24 = vld [vmem:[#allocation7_spill] sm:$0xff] }
 0x2e6   : > { %v1336_v44 = vpop.permute.xlu0 %1335  ;;  %v1083_v58 = vmax.f32 %v2862_v24, 0.0  ;;  %v2875_v24 = vld [vmem:[#allocation12_spill] sm:$0xff] }
 0x2e7   : > { %v1308_v6 = vadd.f32 %v1292_v8, %v1212_v25  ;;  %v1389_v43 = vmul.f32 %v1336_v44, %v1080_v30  ;;  %v2863_v8 = vld [vmem:[#allocation22_spill] sm:$0xff] }
 0x2e9   : > { %v1332_v60 = vpop.permute.xlu1 %1331 }
 0x2ea   : > { %v1388_v10 = vmul.f32 %v1332_v60, %v1076_v16  ;;  %v1368_v19 = vpop.permute.xlu0 %1367  ;;  %v2864_v16 = vld [vmem:[#allocation24_spill] sm:$0xff] }
 0x2eb   : > { %v1397_v54 = vmul.f32 %v1368_v19, %v1112_v11  ;;  %v1115_v36 = vmax.f32 %v2864_v16, 0.0  ;;  %v2871_v11 = vld [vmem:[#allocation10_spill] sm:$0xff] }
 0x2ec   : > { %v1404_v32 = vadd.f32 %v1388_v10, %v1308_v6  ;;  %v1114_v6 = vmax.f32 %v2863_v8, 0.0  ;;  %v2876_v8 = vld [vmem:[#allocation29_spill] sm:$0xff] }
 0x2ed   : > { %v1364_v9 = vpop.permute.xlu1 %1363 }
 0x2ee   : > { %v1396_v31 = vmul.f32 %v1364_v9, %v1108_v23  ;;  %v1084_v9 = vmax.f32 %v2865_v37, 0.0 }
 0x2ef   : > { %v1244_v28 = vpop.permute.xlu0 %1243 }
 0x2f0   : > { %v1412_v21 = vadd.f32 %v1396_v31, %v1316_v52  ;;  %v2861_v52 = vld [vmem:[#allocation5_spill] sm:$0xff]  ;;  %v1294_v25 = vmul.f32 %v1244_v28, %v1083_v58  ;;  %v2866_v31 = vld [vmem:[#allocation8_spill] sm:$0xff]  ;;  %v1089_v58 = vmax.f32 %v2875_v24, 0.0 }
 0x2f1   : > { %v1082_v50 = vmax.f32 %v2861_v52, 0.0  ;;  %v2868_v28 = vld [vmem:[#allocation25_spill] sm:$0xff] }
 0x2f2   : > { %v1508_v1 = vadd.f32 %v1492_v13, %v1412_v21  ;;  %v1428_v7 = vpop.permute.xlu1 %1427  ;;  %v1085_v13 = vmax.f32 %v2866_v31, 0.0  ;;  %v2867_v21 = vld [vmem:[#allocation23_spill] sm:$0xff] }
 0x2f3   : > { %v1484_v0 = vmul.f32 %v1428_v7, %v1077_v39  ;;  %v1276_v42 = vpop.permute.xlu0 %1275  ;;  %v1116_v39 = vmax.f32 %v2867_v21, 0.0  ;;  %v2880_v21 = vld [vmem:[#allocation32_spill] sm:$0xff] }
 0x2f4   : > { %1524 = vst [vmem:[%s2671_s10 + $0x50] sm:$0xff] %v1508_v1  ;;  %v1302_v44 = vmul.f32 %v1276_v42, %v1115_v36 }
 0x2f5   : > { %v1500_v2 = vadd.f32 %v1484_v0, %v1404_v32 }
 0x2f7   : > { %1516 = vst [vmem:[%s2671_s10 + $0x10] sm:$0xff] %v1500_v2  ;;  %v1148_v48 = vpop.permute.xlu1 %1147 }
 0x2f8   : > { %v1213_v18 = vmul.f32 %v1148_v48, %v1078_v38  ;;  %v1436_v55 = vpop.permute.xlu0 %1435  ;;  %v1117_v48 = vmax.f32 %v2868_v28, 0.0 }
 0x2f9   : > { %v1486_v1 = vmul.f32 %v1436_v55, %v1085_v13  ;;  %v2879_v13 = vld [vmem:[#allocation30_spill] sm:$0xff] }
 0x2fc   : > { %v1240_v46 = vpop.permute.xlu1 %1239  ;;  %v1468_v51 = vpop.permute.xlu0 %1467 }
 0x2fd   : > { %v1293_v5 = vmul.f32 %v1240_v46, %v1079_v59  ;;  %v1494_v42 = vmul.f32 %v1468_v51, %v1117_v48 }
 0x2ff   : > { %v1309_v14 = vadd.f32 %v1293_v5, %v1213_v18 }
 0x300   : > { %v1272_v56 = vpop.permute.xlu1 %1271 }
 0x301   : > { %v1301_v49 = vmul.f32 %v1272_v56, %v1111_v20  ;;  %v1405_v45 = vadd.f32 %v1389_v43, %v1309_v14  ;;  %v1198_v34 = vpop.permute.xlu0 %1197  ;;  %v1086_v20 = vmax.f32 %v2869_v4, 0.0  ;;  %v2870_v43 = vld [vmem:[#allocation11_spill] sm:$0xff] }
 0x302   : > { %v1087_v14 = vmax.f32 %v2870_v43, 0.0 }
 0x303   : > { %v1317_v29 = vadd.f32 %v1301_v49, %v1221_v27  ;;  %v1088_v27 = vmax.f32 %v2871_v11, 0.0  ;;  %v2884_v11 = vld [vmem:[#allocation33_spill] sm:$0xff] }
 0x305   : > { %v1432_v61 = vpop.permute.xlu1 %1431  ;;  %v1413_v12 = vadd.f32 %v1397_v54, %v1317_v29  ;;  %v2872_v54 = vld [vmem:[#allocation26_spill] sm:$0xff] }
 0x306   : > { %v1485_v3 = vmul.f32 %v1432_v61, %v1081_v63  ;;  %v1344_v23 = vpop.permute.xlu0 %1343  ;;  %v1118_v29 = vmax.f32 %v2872_v54, 0.0  ;;  %v2873_v63 = vld [vmem:[#allocation28_spill] sm:$0xff] }
 0x307   : > { %v1119_v61 = vmax.f32 %v2873_v63, 0.0 }
 0x308   : > { %v1501_v26 = vadd.f32 %v1485_v3, %v1405_v45 }
 0x309   : > { %v1464_v47 = vpop.permute.xlu1 %1463 }
 0x30a   : > { %1517 = vst [vmem:[%s2671_s10 + $0x18] sm:$0xff] %v1501_v26  ;;  %v1493_v41 = vmul.f32 %v1464_v47, %v1113_v35  ;;  %v1376_v7 = vpop.permute.xlu0 %1375  ;;  %v2874_v35 = vld [vmem:[#allocation27_spill] sm:$0xff]  ;;  %v1223_v26 = vmul.f32 %v1198_v34, %v1118_v29  ;;  %v2877_v34 = vld [vmem:[#allocation13_spill] sm:$0xff] }
 0x30b   : > { %v1120_v51 = vmax.f32 %v2874_v35, 0.0 }
 0x30c   : > { %v1509_v53 = vadd.f32 %v1493_v41, %v1413_v12  ;;  %v1391_v12 = vmul.f32 %v1344_v23, %v1088_v27  ;;  %v2878_v23 = vld [vmem:[#allocation15_spill] sm:$0xff]  ;;  %v1125_v27 = vmax.f32 %v2884_v11, 0.0 }
 0x30e   : > { %1525 = vst [vmem:[%s2671_s10 + $0x58] sm:$0xff] %v1509_v53  ;;  %v1153_v15 = vpop.permute.xlu1 %1152  ;;  %v1399_v53 = vmul.f32 %v1376_v7, %v1120_v51  ;;  %v2887_v51 = vld [vmem:[#allocation18_spill] sm:$0xff] }
 0x30f   : > { %v1214_v57 = vmul.f32 %v1153_v15, %v1082_v50  ;;  %v1252_v30 = vpop.permute.xlu0 %1251 }
 0x311   : > { %v1310_v60 = vadd.f32 %v1294_v25, %v1214_v57 }
 0x312   : > { %v1193_v40 = vpop.permute.xlu1 %1192 }
 0x313   : > { %v1222_v10 = vmul.f32 %v1193_v40, %v1114_v6  ;;  %v1284_v49 = vpop.permute.xlu0 %1283  ;;  %v1121_v6 = vmax.f32 %v2876_v8, 0.0 }
 0x315   : > { %v1318_v32 = vadd.f32 %v1302_v44, %v1222_v10  ;;  %v1090_v10 = vmax.f32 %v2877_v34, 0.0 }
 0x317   : > { %v1340_v17 = vpop.permute.xlu1 %1339 }
 0x318   : > { %v1390_v19 = vmul.f32 %v1340_v17, %v1084_v9  ;;  %v1444_v52 = vpop.permute.xlu0 %1443 }
 0x31a   : > { %v1406_v0 = vadd.f32 %v1390_v19, %v1310_v60  ;;  %v1122_v19 = vmax.f32 %v2879_v13, 0.0 }
 0x31b   : > { %v1372_v2 = vpop.permute.xlu1 %1371 }
 0x31c   : > { %v1502_v38 = vadd.f32 %v1486_v1, %v1406_v0  ;;  %v1398_v59 = vmul.f32 %v1372_v2, %v1116_v39  ;;  %v1123_v39 = vmax.f32 %v2880_v21, 0.0 }
 0x31d   : > { %v1208_v36 = vpop.permute.xlu0 %1207 }
 0x31e   : > { %1518 = vst [vmem:[%s2671_s10 + $0x20] sm:$0xff] %v1502_v38  ;;  %v1414_v46 = vadd.f32 %v1398_v59, %v1318_v32  ;;  %v1091_v32 = vmax.f32 %v2878_v23, 0.0  ;;  %v1304_v0 = vmul.f32 %v1284_v49, %v1123_v39  ;;  %v2881_v38 = vld [vmem:[#allocation14_spill] sm:$0xff] }
 0x31f   : > { %v1092_v59 = vmax.f32 %v2881_v38, 0.0 }
 0x320   : > { %v1510_v18 = vadd.f32 %v1494_v42, %v1414_v46  ;;  %v1158_v5 = vpop.permute.xlu1 %1157  ;;  %v1296_v9 = vmul.f32 %v1252_v30, %v1091_v32  ;;  %v2882_v46 = vld [vmem:[#allocation16_spill] sm:$0xff]  ;;  %v1129_v32 = vmax.f32 %v2571_v33, 0.0 }
 0x321   : > { %v1215_v45 = vmul.f32 %v1158_v5, %v1086_v20  ;;  %v2883_v5 = vld [vmem:[#allocation31_spill] sm:$0xff] }
 0x322   : > { %1526 = vst [vmem:[%s2671_s10 + $0x60] sm:$0xff] %v1510_v18  ;;  %v1352_v17 = vpop.permute.xlu0 %1351  ;;  %v1093_v18 = vmax.f32 %v2882_v46, 0.0  ;;  %v1124_v4 = vmax.f32 %v2883_v5, 0.0 }
 0x324   : > { %v1488_v20 = vmul.f32 %v1444_v52, %v1093_v18 }
 0x325   : > { %v1248_v56 = vpop.permute.xlu1 %1247 }
 0x326   : > { %v1295_v55 = vmul.f32 %v1248_v56, %v1087_v14  ;;  %v1384_v28 = vpop.permute.xlu0 %1383 }
 0x328   : > { %v1311_v3 = vadd.f32 %v1295_v55, %v1215_v45 }
 0x329   : > { %v1280_v22 = vpop.permute.xlu1 %1279 }
 0x32a   : > { %v1303_v47 = vmul.f32 %v1280_v22, %v1119_v61  ;;  %v1407_v41 = vadd.f32 %v1391_v12, %v1311_v3  ;;  %v2885_v61 = vld [vmem:[#allocation17_spill] sm:$0xff]  ;;  %v2886_v3 = vld [vmem:[#allocation19_spill] sm:$0xff] }
 0x32b   : > { %v1476_v14 = vpop.permute.xlu0 %1475  ;;  %v1094_v12 = vmax.f32 %v2885_v61, 0.0  ;;  %v1095_v22 = vmax.f32 %v2886_v3, 0.0 }
 0x32c   : > { %v1319_v50 = vadd.f32 %v1303_v47, %v1223_v26  ;;  %v1496_v55 = vmul.f32 %v1476_v14, %v1125_v27  ;;  %v1096_v26 = vmax.f32 %v2887_v51, 0.0 }
 0x32e   : > { %v1440_v15 = vpop.permute.xlu1 %1439  ;;  %v1415_v25 = vadd.f32 %v1399_v53, %v1319_v50  ;;  %v2888_v53 = vld [vmem:[#allocation34_spill] sm:$0xff]  ;;  %v1127_v50 = vmax.f32 %v2568_v62, 0.0  ;;  %v1393_v24 = vmul.f32 %v1352_v17, %v1096_v26 }
 0x32f   : > { %v1487_v57 = vmul.f32 %v1440_v15, %v1089_v58  ;;  %v1126_v52 = vmax.f32 %v2888_v53, 0.0 }
 0x331   : > { %v1503_v16 = vadd.f32 %v1487_v57, %v1407_v41  ;;  %v1225_v8 = vmul.f32 %v1208_v36, %v1126_v52 }
 0x332   : > { %v1472_v60 = vpop.permute.xlu1 %1471 }
 0x333   : > { %1519 = vst [vmem:[%s2671_s10 + $0x28] sm:$0xff] %v1503_v16  ;;  %v1495_v40 = vmul.f32 %v1472_v60, %v1121_v6 }
 0x335   : > { %v1511_v44 = vadd.f32 %v1495_v40, %v1415_v25  ;;  %v2889_v25 = vld [vmem:[#allocation35_spill] sm:$0xff] }
 0x336   : > { %v1128_v57 = vmax.f32 %v2889_v25, 0.0 }
 0x337   : > { %1527 = vst [vmem:[%s2671_s10 + $0x68] sm:$0xff] %v1511_v44  ;;  %v1163_v37 = vpop.permute.xlu1 %1162  ;;  %v2890_v44 = vld [vmem:[#allocation20_spill] sm:$0xff] }
 0x338   : > { %v1216_v31 = vmul.f32 %v1163_v37, %v1090_v10  ;;  %v1401_v60 = vmul.f32 %v1384_v28, %v1128_v57  ;;  %v1097_v34 = vmax.f32 %v2890_v44, 0.0 }
 0x33a   : > { %v1312_v1 = vadd.f32 %v1296_v9, %v1216_v31 }
 0x33b   : > { %v1203_v7 = vpop.permute.xlu1 %1202 }
 0x33c   : > { %v1224_v2 = vmul.f32 %v1203_v7, %v1122_v19 }
 0x33e   : > { %v1320_v48 = vadd.f32 %v1304_v0, %v1224_v2 }
 0x340   : > { %v1348_v42 = vpop.permute.xlu1 %1347 }
 0x341   : > { %v1392_v30 = vmul.f32 %v1348_v42, %v1092_v59 }
 0x343   : > { %v1408_v43 = vadd.f32 %v1392_v30, %v1312_v1 }
 0x344   : > { %v1380_v56 = vpop.permute.xlu1 %1379 }
 0x345   : > { %v1504_v49 = vadd.f32 %v1488_v20, %v1408_v43  ;;  %v1400_v45 = vmul.f32 %v1380_v56, %v1124_v4 }
 0x347   : > { %1520 = vst [vmem:[%s2671_s10 + $0x30] sm:$0xff] %v1504_v49  ;;  %v1416_v54 = vadd.f32 %v1400_v45, %v1320_v48 }
 0x349   : > { %v1512_v29 = vadd.f32 %v1496_v55, %v1416_v54  ;;  %v1168_v63 = vpop.permute.xlu1 %1167 }
 0x34a   : > { %v1217_v47 = vmul.f32 %v1168_v63, %v1094_v12 }
 0x34b   : > { %1528 = vst [vmem:[%s2671_s10 + $0x70] sm:$0xff] %v1512_v29 }
 0x34e   : > { %v1256_v35 = vpop.permute.xlu1 %1255 }
 0x34f   : > { %v1297_v41 = vmul.f32 %v1256_v35, %v1095_v22 }
 0x351   : > { %v1313_v58 = vadd.f32 %v1297_v41, %v1217_v47 }
 0x352   : > { %v1288_v15 = vpop.permute.xlu1 %1287 }
 0x353   : > { %v1305_v6 = vmul.f32 %v1288_v15, %v1127_v50  ;;  %v1409_v16 = vadd.f32 %v1393_v24, %v1313_v58 }
 0x355   : > { %v1321_v40 = vadd.f32 %v1305_v6, %v1225_v8 }
 0x357   : > { %v1448_v10 = vpop.permute.xlu1 %1447  ;;  %v1417_v23 = vadd.f32 %v1401_v60, %v1321_v40 }
 0x358   : > { %v1489_v62 = vmul.f32 %v1448_v10, %v1097_v34 }
 0x35a   : > { %v1505_v37 = vadd.f32 %v1489_v62, %v1409_v16 }
 0x35b   : > { %v1480_v9 = vpop.permute.xlu1 %1479 }
 0x35c   : > { %1521 = vst [vmem:[%s2671_s10 + $0x38] sm:$0xff] %v1505_v37  ;;  %v1497_v36 = vmul.f32 %v1480_v9, %v1129_v32 }
 0x35e   : > { %v1513_v17 = vadd.f32 %v1497_v36, %v1417_v23 }
 0x360   : > { %1529 = vst [vmem:[%s2671_s10 + $0x78] sm:$0xff] %v1513_v17 }
 0x361   : > { %1889 = shalt.err (!%p1886_p3)
}
 0x362   : > { %s1890_s30 = scalar_lea.hbm %s2770_s15, 2048  ;;  %s1894_s7 = scalar_lea.hbm %s2823_s5, 4096 }
 0x363   : > { %p1891_p4 = scmp.ne.s32.totalorder %s2770_s15, %s1890_s30  ;;  %p1895_p9 = scmp.lt.u32.totalorder %s2770_s15, %s2823_s5 }
 0x364   : > { %p1896_p10 = scmp.lt.u32.totalorder %s1894_s7, %s1890_s30  ;;  %p1898_p12 = scmp.lt.u32.totalorder %s1890_s30, %s2770_s15 }
 0x365   : > { %p1892_p7 = pnand %p1891_p4, %p2015_p5 }
 0x366   : > { %p1897_p11 = por %p1896_p10, %p1895_p9 }
 0x367   : > { %p1893_p8 = pneg %p1892_p7 }
 0x368   : > { %p1899_p13 = por %p1898_p12, %p1897_p11 }
 0x36a   : > { %p1900_p0 = pnand %p1899_p13, %p1893_p8 }
 0x36c   : > { %1903 = shalt.err (!%p1900_p0)
}
 0x36d   : > { %s1945_s10 = smov 128   ;;  %s1946_s11 = smov 8  }
 0x36e   : > { %1667 = dma.vmem_to_hbm [thread:$0]  (%p2015_p5), %s2772_s12, 2048, %s2770_s15, %s2777_s16, %s1945_s10, %s1945_s10, %s1946_s11  }
 0x36f PF: > { %p1673_p1 = scmp.ge.s32.totalorder %s1938_s21, 2  ;;  %s1559_s13 = sand.u32 1, %s1926_s18  }
 0x370   : > { %s1560_s14 = scalar_lea.sflag [#allocation3], %s1559_s13 }
 0x371   : > { %p1670_p2 = pnand %p1673_p1, %p2019_p6 }
 0x373   : > { %1921 = dma.done.wait (!%p1670_p2), %s1560_s14, 2048  }
 0x374   : > { %1923 = vsyncadd (!%p1670_p2), %s1560_s14, 4294965248  ;;  %p15_p3 = scmp.ge.s32.totalorder %s2002_s24, 4   ;;  %s2891_s18 = smov %s1930_s19 }
 0x375   : > { %s2892_s19 = smov %s1934_s20  ;;  %s2893_s20 = smov %s2013_s27 }
 0x376   : > { %s2894_s21 = smov %s2002_s24  ;;  %17 = sbr.rel (!%p15_p3) target bundleno = 3 (0x3), region = 75 }
 0x37d   :  { %1565 = vsyncpa [#allocation3], 1 }
 0x37e   :  { %1567 = vsyncpa [#allocation3 + $0x1], 1 }

</bundles_post_ra>
